<compile_context>
chip_gen: v7x
topology: tpu7x:2x2x1
jax: 0.10.0
libtpu: 0.0.40
codegen_flags: <defaults>
</compile_context>

<pallas_src>
import jax
import jax.numpy as jnp
import numpy as np
from jax import lax
from jax.experimental import pallas as pl
from jax.experimental.pallas import tpu as pltpu


def _make_dense_layer_kernel(n_prev, nb, W):
    """Builds the kernel for `n_prev` prev_features, `nb` images per grid step."""

    def kernel(*refs):
        x_refs = refs[:n_prev]
        (s1_ref, b1_ref, w1t_ref, s2_ref, b2_ref,
         w2c_ref, mask_ref, o_ref) = refs[n_prev:]

        # Small per-call constants (loaded once per grid step).
        w1t = w1t_ref[...]                       # (Cmid, Cin)      bf16
        w2c = w2c_ref[...]                       # (Cout, 9*Cmid)   bf16
        s1, b1 = s1_ref[...], b1_ref[...]        # (Cin, 1)         f32
        s2, b2 = s2_ref[...], b2_ref[...]        # (Cmid, 1)        f32
        masks = mask_ref[...]                    # (9, H*W) 0/1     f32

        for b in range(nb):                      # unrolled batch block
            # --- in-kernel channel concat of prev_features (NCHW, HW-flat) ---
            if n_prev == 1:
                x = x_refs[0][b]                                   # (Cin, HW)
            else:
                x = jnp.concatenate([r[b] for r in x_refs], axis=0)

            # --- BN1 (folded scale/bias) + ReLU1, f32 elementwise ---
            y1 = jnp.maximum(x * s1 + b1, 0.0)                     # (Cin, HW)

            # --- conv1 1x1 == channels-first matmul, bf16 in / f32 acc ---
            z = jnp.dot(w1t, y1.astype(jnp.bfloat16),
                        preferred_element_type=jnp.float32)        # (Cmid, HW)

            # --- BN2 (folded) + ReLU2 ---
            y2 = jnp.maximum(z * s2 + b2, 0.0)                     # (Cmid, HW)

            # --- conv2 3x3, padding=1, as ONE im2col matmul.
            # tap (dy,dx): shift the flattened spatial axis by dy*W+dx and zero
            # the positions whose neighbour falls outside the image (masks are
            # precomputed 0/1 rows, one per tap).  No padded scratch needed.
            taps = []
            t = 0
            for dy in (-1, 0, 1):
                for dx in (-1, 0, 1):
                    shift = dy * W + dx
                    tap = y2 if shift == 0 else jnp.roll(y2, -shift, axis=1)
                    taps.append(tap * masks[t:t + 1, :])
                    t += 1
            im2col = jnp.concatenate(taps, axis=0).astype(jnp.bfloat16)  # (9*Cmid, HW)

            out = jnp.dot(w2c, im2col,
                          preferred_element_type=jnp.float32)      # (Cout, HW)
            o_ref[b] = out.astype(o_ref.dtype)                     # lane dim = HW

    return kernel


def _border_masks(H, W):
    """(9, H*W) float32 0/1 masks, tap-major in (dy, dx) row order."""
    hh, ww = np.meshgrid(np.arange(H), np.arange(W), indexing="ij")
    rows = []
    for dy in (-1, 0, 1):
        for dx in (-1, 0, 1):
            valid = ((hh + dy >= 0) & (hh + dy < H) &
                     (ww + dx >= 0) & (ww + dx < W))
            rows.append(valid.reshape(-1))
    return jnp.asarray(np.stack(rows).astype(np.float32))


def dense_layer_2d(prev_features_nchw, scale1, bias1, w1_t, scale2, bias2, w2_t,
                   *, batch_block=8):
    """Inference-mode _DenseLayer2D forward.

    prev_features_nchw: list of (N, Ci, H, W) float32 arrays (PyTorch NCHW).
    scale1/bias1: folded BN1 per-channel scale/bias, shape (Cin,).
    w1_t: (Cmid, Cin) 1x1-conv weight (torch (Cmid, Cin, 1, 1) squeezed).
    scale2/bias2: folded BN2 per-channel scale/bias, shape (Cmid,).
    w2_t: (Cout, Cmid, 3, 3) torch conv weight.
    Returns (N, Cout, H, W) float32.
    """
    N, _, H, W = prev_features_nchw[0].shape
    HW = H * W
    Cin = sum(int(x.shape[1]) for x in prev_features_nchw)
    Cmid = int(w1_t.shape[0])
    Cout = int(w2_t.shape[0])

    # Batch block: largest divisor of N that is <= batch_block.
    nb = 1
    for cand in range(min(batch_block, N), 0, -1):
        if N % cand == 0:
            nb = cand
            break

    # Free reshapes only: stay channel-major (NCHW) with spatial flattened.
    xs = [x.reshape(x.shape[0], x.shape[1], HW) for x in prev_features_nchw]

    s1 = scale1.reshape(Cin, 1).astype(jnp.float32)
    b1 = bias1.reshape(Cin, 1).astype(jnp.float32)
    s2 = scale2.reshape(Cmid, 1).astype(jnp.float32)
    b2 = bias2.reshape(Cmid, 1).astype(jnp.float32)
    w1t = w1_t.astype(jnp.bfloat16)                                   # (Cmid, Cin)
    # w2col[o, (ky*3+kx)*Cmid + c] = w2_t[o, c, ky, kx]
    w2col = jnp.transpose(w2_t, (0, 2, 3, 1)).reshape(Cout, 9 * Cmid).astype(jnp.bfloat16)
    masks = _border_masks(H, W)                                       # (9, HW)

    kernel = _make_dense_layer_kernel(len(xs), nb, W)

    in_specs = []
    for x in xs:
        ci = int(x.shape[1])
        in_specs.append(pl.BlockSpec((nb, ci, HW), lambda n: (n, 0, 0)))
    for arr in (s1, b1, w1t, s2, b2, w2col, masks):
        nd = arr.ndim
        in_specs.append(pl.BlockSpec(arr.shape, lambda n, _nd=nd: (0,) * _nd))

    out = pl.pallas_call(
        kernel,
        out_shape=jax.ShapeDtypeStruct((N, Cout, HW), jnp.float32),
        grid=(N // nb,),
        in_specs=in_specs,
        out_specs=pl.BlockSpec((nb, Cout, HW), lambda n: (n, 0, 0)),
        compiler_params=pltpu.CompilerParams(dimension_semantics=("parallel",)),
    )(*xs, s1, b1, w1t, s2, b2, w2col, masks)

    return out.reshape(N, Cout, H, W)                                 # NCHW, free


def reference(prev_features_nchw, scale1, bias1, w1_t, scale2, bias2, w2_t):
    """Pure-JAX NCHW reference (eval-mode BN folded identically), float32."""
    x = jnp.concatenate(prev_features_nchw, axis=1)                   # (N, Cin, H, W)
    y1 = jnp.maximum(x * scale1[None, :, None, None]
                     + bias1[None, :, None, None], 0.0)
    z = lax.conv_general_dilated(y1, w1_t[:, :, None, None], (1, 1), 'SAME',
                                 dimension_numbers=('NCHW', 'OIHW', 'NCHW'))
    y2 = jnp.maximum(z * scale2[None, :, None, None]
                     + bias2[None, :, None, None], 0.0)
    out = lax.conv_general_dilated(y2, w2_t, (1, 1), 'SAME',
                                   dimension_numbers=('NCHW', 'OIHW', 'NCHW'))
    return out


if __name__ == "__main__":
    key = jax.random.PRNGKey(0)
    ks = jax.random.split(key, 12)

    # Small shapes consistent with the module.
    N, H, W = 2, 8, 8
    prev_channels = (8, 8)                  # two prev_features -> concat = 16 ch
    growth_rate, bn_size, drop_rate = 8, 4, 0.0
    Cin = sum(prev_channels)                # num_input_features = 16
    Cmid = bn_size * growth_rate            # 32
    Cout = growth_rate                      # 8
    eps = 1e-5

    prev_feats = [jax.random.normal(ks[i], (N, c, H, W), jnp.float32)
                  for i, c in enumerate(prev_channels)]

    # BatchNorm2d(Cin) parameters (eval-mode running stats)
    g1 = jax.random.uniform(ks[2], (Cin,), minval=0.5, maxval=1.5)
    be1 = 0.1 * jax.random.normal(ks[3], (Cin,))
    m1 = 0.1 * jax.random.normal(ks[4], (Cin,))
    v1 = jax.random.uniform(ks[5], (Cin,), minval=0.5, maxval=1.5)
    # Conv2d(Cin, Cmid, 1, bias=False): torch weight (Cmid, Cin, 1, 1) squeezed
    w1_t = jax.random.normal(ks[6], (Cmid, Cin), jnp.float32) * (2.0 / Cin) ** 0.5
    # BatchNorm2d(Cmid)
    g2 = jax.random.uniform(ks[7], (Cmid,), minval=0.5, maxval=1.5)
    be2 = 0.1 * jax.random.normal(ks[8], (Cmid,))
    m2 = 0.1 * jax.random.normal(ks[9], (Cmid,))
    v2 = jax.random.uniform(ks[10], (Cmid,), minval=0.5, maxval=1.5)
    # Conv2d(Cmid, Cout, 3, padding=1, bias=False): torch weight (Cout, Cmid, 3, 3)
    w2_t = jax.random.normal(ks[11], (Cout, Cmid, 3, 3), jnp.float32) * (2.0 / (Cmid * 9)) ** 0.5

    # Fold BN (running stats) into per-channel scale/bias.
    scale1 = g1 / jnp.sqrt(v1 + eps)
    bias1 = be1 - m1 * scale1
    scale2 = g2 / jnp.sqrt(v2 + eps)
    bias2 = be2 - m2 * scale2

    out = dense_layer_2d(prev_feats, scale1, bias1, w1_t, scale2, bias2, w2_t)
    out = jax.block_until_ready(out)

    ref = jax.block_until_ready(
        reference(prev_feats, scale1, bias1, w1_t, scale2, bias2, w2_t))

    assert out.shape == (N, Cout, H, W), out.shape
    # Tolerance sized for bf16 MXU operands with f32 accumulation vs. f32 ref.
    if not np.allclose(np.asarray(out), np.asarray(ref), rtol=5e-2, atol=5e-2):
        raise AssertionError(
            f"mismatch: max abs err = {np.max(np.abs(np.asarray(out) - np.asarray(ref)))}")

    print("KERNEL_OK")
</pallas_src>

<mosaic_0001>
module attributes {stable_mosaic.version = 11 : i64} {
  func.func @kernel(%arg0: i32, %arg1: memref<2x8x64xf32, #tpu.memory_space<vmem>>, %arg2: memref<2x8x64xf32, #tpu.memory_space<vmem>>, %arg3: memref<16x1xf32, #tpu.memory_space<vmem>>, %arg4: memref<16x1xf32, #tpu.memory_space<vmem>>, %arg5: memref<32x16xbf16, #tpu.memory_space<vmem>>, %arg6: memref<32x1xf32, #tpu.memory_space<vmem>>, %arg7: memref<32x1xf32, #tpu.memory_space<vmem>>, %arg8: memref<8x288xbf16, #tpu.memory_space<vmem>>, %arg9: memref<9x64xf32, #tpu.memory_space<vmem>>, %arg10: memref<2x8x64xf32, #tpu.memory_space<vmem>>) attributes {dimension_semantics = [#tpu.dimension_semantics<parallel>], iteration_bounds = array<i64: 1>, scalar_prefetch = 0 : i64, scratch_operands = 0 : i64, tpu.core_type = #tpu.core_type<tc>, window_params = [{transform_indices = @transform_0, window_bounds = array<i64: 2, 8, 64>}, {transform_indices = @transform_1, window_bounds = array<i64: 2, 8, 64>}, {pipeline_mode = #tpu.pipeline_mode<synchronous>, transform_indices = @transform_2, window_bounds = array<i64: 16, 1>}, {pipeline_mode = #tpu.pipeline_mode<synchronous>, transform_indices = @transform_3, window_bounds = array<i64: 16, 1>}, {pipeline_mode = #tpu.pipeline_mode<synchronous>, transform_indices = @transform_4, window_bounds = array<i64: 32, 16>}, {pipeline_mode = #tpu.pipeline_mode<synchronous>, transform_indices = @transform_5, window_bounds = array<i64: 32, 1>}, {pipeline_mode = #tpu.pipeline_mode<synchronous>, transform_indices = @transform_6, window_bounds = array<i64: 32, 1>}, {pipeline_mode = #tpu.pipeline_mode<synchronous>, transform_indices = @transform_7, window_bounds = array<i64: 8, 288>}, {pipeline_mode = #tpu.pipeline_mode<synchronous>, transform_indices = @transform_8, window_bounds = array<i64: 9, 64>}, {transform_indices = @transform_9, window_bounds = array<i64: 2, 8, 64>}]} {
    %c0 = arith.constant 0 : index
    %c0_0 = arith.constant 0 : index
    %0 = vector.load %arg5[%c0, %c0_0] : memref<32x16xbf16, #tpu.memory_space<vmem>>, vector<32x16xbf16>
    %c0_1 = arith.constant 0 : index
    %c0_2 = arith.constant 0 : index
    %1 = vector.load %arg8[%c0_1, %c0_2] : memref<8x288xbf16, #tpu.memory_space<vmem>>, vector<8x288xbf16>
    %c0_3 = arith.constant 0 : index
    %c0_4 = arith.constant 0 : index
    %2 = vector.load %arg3[%c0_3, %c0_4] : memref<16x1xf32, #tpu.memory_space<vmem>>, vector<16x1xf32>
    %c0_5 = arith.constant 0 : index
    %c0_6 = arith.constant 0 : index
    %3 = vector.load %arg4[%c0_5, %c0_6] : memref<16x1xf32, #tpu.memory_space<vmem>>, vector<16x1xf32>
    %c0_7 = arith.constant 0 : index
    %c0_8 = arith.constant 0 : index
    %4 = vector.load %arg6[%c0_7, %c0_8] : memref<32x1xf32, #tpu.memory_space<vmem>>, vector<32x1xf32>
    %c0_9 = arith.constant 0 : index
    %c0_10 = arith.constant 0 : index
    %5 = vector.load %arg7[%c0_9, %c0_10] : memref<32x1xf32, #tpu.memory_space<vmem>>, vector<32x1xf32>
    %c0_11 = arith.constant 0 : index
    %c0_12 = arith.constant 0 : index
    %6 = vector.load %arg9[%c0_11, %c0_12] : memref<9x64xf32, #tpu.memory_space<vmem>>, vector<9x64xf32>
    %c0_13 = arith.constant 0 : index
    %c0_14 = arith.constant 0 : index
    %c0_15 = arith.constant 0 : index
    %7 = vector.load %arg1[%c0_13, %c0_14, %c0_15] : memref<2x8x64xf32, #tpu.memory_space<vmem>>, vector<1x8x64xf32>
    %8 = vector.shape_cast %7 : vector<1x8x64xf32> to vector<8x64xf32>
    %c0_16 = arith.constant 0 : index
    %c0_17 = arith.constant 0 : index
    %c0_18 = arith.constant 0 : index
    %9 = vector.load %arg2[%c0_16, %c0_17, %c0_18] : memref<2x8x64xf32, #tpu.memory_space<vmem>>, vector<1x8x64xf32>
    %10 = vector.shape_cast %9 : vector<1x8x64xf32> to vector<8x64xf32>
    %11 = tpu.concatenate %8, %10 in 0 : vector<8x64xf32>, vector<8x64xf32> -> vector<16x64xf32>
    %12 = vector.broadcast %2 : vector<16x1xf32> to vector<16x64xf32>
    %13 = arith.mulf %11, %12 : vector<16x64xf32>
    %14 = vector.broadcast %3 : vector<16x1xf32> to vector<16x64xf32>
    %15 = arith.addf %13, %14 : vector<16x64xf32>
    %cst = arith.constant 0.000000e+00 : f32
    %16 = vector.broadcast %cst : f32 to vector<16x64xf32>
    %17 = arith.maximumf %15, %16 : vector<16x64xf32>
    %18 = arith.truncf %17 : vector<16x64xf32> to vector<16x64xbf16>
    %cst_19 = arith.constant dense<0.000000e+00> : vector<32x64xf32>
    %19 = tpu.matmul %0, %18, %cst_19 {dimension_numbers = #tpu.dot_dimension_numbers<[1], [0], [0], [1], [0, 0, 1, 1], [], []>} : vector<32x16xbf16>, vector<16x64xbf16>, vector<32x64xf32> -> vector<32x64xf32>
    %20 = vector.broadcast %4 : vector<32x1xf32> to vector<32x64xf32>
    %21 = arith.mulf %19, %20 : vector<32x64xf32>
    %22 = vector.broadcast %5 : vector<32x1xf32> to vector<32x64xf32>
    %23 = arith.addf %21, %22 : vector<32x64xf32>
    %cst_20 = arith.constant 0.000000e+00 : f32
    %24 = vector.broadcast %cst_20 : f32 to vector<32x64xf32>
    %25 = arith.maximumf %23, %24 : vector<32x64xf32>
    %26 = vector.extract_strided_slice %25 {offsets = [0, 55], sizes = [32, 9], strides = [1, 1]} : vector<32x64xf32> to vector<32x9xf32>
    %27 = vector.extract_strided_slice %25 {offsets = [0, 0], sizes = [32, 55], strides = [1, 1]} : vector<32x64xf32> to vector<32x55xf32>
    %28 = tpu.concatenate %26, %27 in 1 : vector<32x9xf32>, vector<32x55xf32> -> vector<32x64xf32>
    %29 = vector.extract_strided_slice %6 {offsets = [0, 0], sizes = [1, 64], strides = [1, 1]} : vector<9x64xf32> to vector<1x64xf32>
    %30 = vector.broadcast %29 : vector<1x64xf32> to vector<32x64xf32>
    %31 = arith.mulf %28, %30 : vector<32x64xf32>
    %32 = vector.extract_strided_slice %25 {offsets = [0, 56], sizes = [32, 8], strides = [1, 1]} : vector<32x64xf32> to vector<32x8xf32>
    %33 = vector.extract_strided_slice %25 {offsets = [0, 0], sizes = [32, 56], strides = [1, 1]} : vector<32x64xf32> to vector<32x56xf32>
    %34 = tpu.concatenate %32, %33 in 1 : vector<32x8xf32>, vector<32x56xf32> -> vector<32x64xf32>
    %35 = vector.extract_strided_slice %6 {offsets = [1, 0], sizes = [1, 64], strides = [1, 1]} : vector<9x64xf32> to vector<1x64xf32>
    %36 = vector.broadcast %35 : vector<1x64xf32> to vector<32x64xf32>
    %37 = arith.mulf %34, %36 : vector<32x64xf32>
    %38 = vector.extract_strided_slice %25 {offsets = [0, 57], sizes = [32, 7], strides = [1, 1]} : vector<32x64xf32> to vector<32x7xf32>
    %39 = vector.extract_strided_slice %25 {offsets = [0, 0], sizes = [32, 57], strides = [1, 1]} : vector<32x64xf32> to vector<32x57xf32>
    %40 = tpu.concatenate %38, %39 in 1 : vector<32x7xf32>, vector<32x57xf32> -> vector<32x64xf32>
    %41 = vector.extract_strided_slice %6 {offsets = [2, 0], sizes = [1, 64], strides = [1, 1]} : vector<9x64xf32> to vector<1x64xf32>
    %42 = vector.broadcast %41 : vector<1x64xf32> to vector<32x64xf32>
    %43 = arith.mulf %40, %42 : vector<32x64xf32>
    %44 = vector.extract_strided_slice %25 {offsets = [0, 63], sizes = [32, 1], strides = [1, 1]} : vector<32x64xf32> to vector<32x1xf32>
    %45 = vector.extract_strided_slice %25 {offsets = [0, 0], sizes = [32, 63], strides = [1, 1]} : vector<32x64xf32> to vector<32x63xf32>
    %46 = tpu.concatenate %44, %45 in 1 : vector<32x1xf32>, vector<32x63xf32> -> vector<32x64xf32>
    %47 = vector.extract_strided_slice %6 {offsets = [3, 0], sizes = [1, 64], strides = [1, 1]} : vector<9x64xf32> to vector<1x64xf32>
    %48 = vector.broadcast %47 : vector<1x64xf32> to vector<32x64xf32>
    %49 = arith.mulf %46, %48 : vector<32x64xf32>
    %50 = vector.extract_strided_slice %6 {offsets = [4, 0], sizes = [1, 64], strides = [1, 1]} : vector<9x64xf32> to vector<1x64xf32>
    %51 = vector.broadcast %50 : vector<1x64xf32> to vector<32x64xf32>
    %52 = arith.mulf %25, %51 : vector<32x64xf32>
    %53 = vector.extract_strided_slice %25 {offsets = [0, 1], sizes = [32, 63], strides = [1, 1]} : vector<32x64xf32> to vector<32x63xf32>
    %54 = vector.extract_strided_slice %25 {offsets = [0, 0], sizes = [32, 1], strides = [1, 1]} : vector<32x64xf32> to vector<32x1xf32>
    %55 = tpu.concatenate %53, %54 in 1 : vector<32x63xf32>, vector<32x1xf32> -> vector<32x64xf32>
    %56 = vector.extract_strided_slice %6 {offsets = [5, 0], sizes = [1, 64], strides = [1, 1]} : vector<9x64xf32> to vector<1x64xf32>
    %57 = vector.broadcast %56 : vector<1x64xf32> to vector<32x64xf32>
    %58 = arith.mulf %55, %57 : vector<32x64xf32>
    %59 = vector.extract_strided_slice %25 {offsets = [0, 7], sizes = [32, 57], strides = [1, 1]} : vector<32x64xf32> to vector<32x57xf32>
    %60 = vector.extract_strided_slice %25 {offsets = [0, 0], sizes = [32, 7], strides = [1, 1]} : vector<32x64xf32> to vector<32x7xf32>
    %61 = tpu.concatenate %59, %60 in 1 : vector<32x57xf32>, vector<32x7xf32> -> vector<32x64xf32>
    %62 = vector.extract_strided_slice %6 {offsets = [6, 0], sizes = [1, 64], strides = [1, 1]} : vector<9x64xf32> to vector<1x64xf32>
    %63 = vector.broadcast %62 : vector<1x64xf32> to vector<32x64xf32>
    %64 = arith.mulf %61, %63 : vector<32x64xf32>
    %65 = vector.extract_strided_slice %25 {offsets = [0, 8], sizes = [32, 56], strides = [1, 1]} : vector<32x64xf32> to vector<32x56xf32>
    %66 = vector.extract_strided_slice %25 {offsets = [0, 0], sizes = [32, 8], strides = [1, 1]} : vector<32x64xf32> to vector<32x8xf32>
    %67 = tpu.concatenate %65, %66 in 1 : vector<32x56xf32>, vector<32x8xf32> -> vector<32x64xf32>
    %68 = vector.extract_strided_slice %6 {offsets = [7, 0], sizes = [1, 64], strides = [1, 1]} : vector<9x64xf32> to vector<1x64xf32>
    %69 = vector.broadcast %68 : vector<1x64xf32> to vector<32x64xf32>
    %70 = arith.mulf %67, %69 : vector<32x64xf32>
    %71 = vector.extract_strided_slice %25 {offsets = [0, 9], sizes = [32, 55], strides = [1, 1]} : vector<32x64xf32> to vector<32x55xf32>
    %72 = vector.extract_strided_slice %25 {offsets = [0, 0], sizes = [32, 9], strides = [1, 1]} : vector<32x64xf32> to vector<32x9xf32>
    %73 = tpu.concatenate %71, %72 in 1 : vector<32x55xf32>, vector<32x9xf32> -> vector<32x64xf32>
    %74 = vector.extract_strided_slice %6 {offsets = [8, 0], sizes = [1, 64], strides = [1, 1]} : vector<9x64xf32> to vector<1x64xf32>
    %75 = vector.broadcast %74 : vector<1x64xf32> to vector<32x64xf32>
    %76 = arith.mulf %73, %75 : vector<32x64xf32>
    %77 = tpu.concatenate %31, %37, %43, %49, %52, %58, %64, %70, %76 in 0 : vector<32x64xf32>, vector<32x64xf32>, vector<32x64xf32>, vector<32x64xf32>, vector<32x64xf32>, vector<32x64xf32>, vector<32x64xf32>, vector<32x64xf32>, vector<32x64xf32> -> vector<288x64xf32>
    %78 = arith.truncf %77 : vector<288x64xf32> to vector<288x64xbf16>
    %cst_21 = arith.constant dense<0.000000e+00> : vector<8x64xf32>
    %79 = tpu.matmul %1, %78, %cst_21 {dimension_numbers = #tpu.dot_dimension_numbers<[1], [0], [0], [1], [0, 0, 1, 1], [], []>} : vector<8x288xbf16>, vector<288x64xbf16>, vector<8x64xf32> -> vector<8x64xf32>
    %c0_22 = arith.constant 0 : index
    %c0_23 = arith.constant 0 : index
    %c0_24 = arith.constant 0 : index
    %80 = vector.load %arg10[%c0_22, %c0_23, %c0_24] : memref<2x8x64xf32, #tpu.memory_space<vmem>>, vector<1x8x64xf32>
    %81 = vector.shape_cast %80 : vector<1x8x64xf32> to vector<8x64xf32>
    %82 = vector.shape_cast %79 : vector<8x64xf32> to vector<1x8x64xf32>
    tpu.vector_store %arg10[%c0_22, %c0_23, %c0_24], %82 {strides = array<i32>} : memref<2x8x64xf32, #tpu.memory_space<vmem>>, vector<1x8x64xf32>,
    %c1 = arith.constant 1 : index
    %c0_25 = arith.constant 0 : index
    %c0_26 = arith.constant 0 : index
    %83 = vector.load %arg1[%c1, %c0_25, %c0_26] : memref<2x8x64xf32, #tpu.memory_space<vmem>>, vector<1x8x64xf32>
    %84 = vector.shape_cast %83 : vector<1x8x64xf32> to vector<8x64xf32>
    %c1_27 = arith.constant 1 : index
    %c0_28 = arith.constant 0 : index
    %c0_29 = arith.constant 0 : index
    %85 = vector.load %arg2[%c1_27, %c0_28, %c0_29] : memref<2x8x64xf32, #tpu.memory_space<vmem>>, vector<1x8x64xf32>
    %86 = vector.shape_cast %85 : vector<1x8x64xf32> to vector<8x64xf32>
    %87 = tpu.concatenate %84, %86 in 0 : vector<8x64xf32>, vector<8x64xf32> -> vector<16x64xf32>
    %88 = vector.broadcast %2 : vector<16x1xf32> to vector<16x64xf32>
    %89 = arith.mulf %87, %88 : vector<16x64xf32>
    %90 = vector.broadcast %3 : vector<16x1xf32> to vector<16x64xf32>
    %91 = arith.addf %89, %90 : vector<16x64xf32>
    %cst_30 = arith.constant 0.000000e+00 : f32
    %92 = vector.broadcast %cst_30 : f32 to vector<16x64xf32>
    %93 = arith.maximumf %91, %92 : vector<16x64xf32>
    %94 = arith.truncf %93 : vector<16x64xf32> to vector<16x64xbf16>
    %cst_31 = arith.constant dense<0.000000e+00> : vector<32x64xf32>
    %95 = tpu.matmul %0, %94, %cst_31 {dimension_numbers = #tpu.dot_dimension_numbers<[1], [0], [0], [1], [0, 0, 1, 1], [], []>} : vector<32x16xbf16>, vector<16x64xbf16>, vector<32x64xf32> -> vector<32x64xf32>
    %96 = vector.broadcast %4 : vector<32x1xf32> to vector<32x64xf32>
    %97 = arith.mulf %95, %96 : vector<32x64xf32>
    %98 = vector.broadcast %5 : vector<32x1xf32> to vector<32x64xf32>
    %99 = arith.addf %97, %98 : vector<32x64xf32>
    %cst_32 = arith.constant 0.000000e+00 : f32
    %100 = vector.broadcast %cst_32 : f32 to vector<32x64xf32>
    %101 = arith.maximumf %99, %100 : vector<32x64xf32>
    %102 = vector.extract_strided_slice %101 {offsets = [0, 55], sizes = [32, 9], strides = [1, 1]} : vector<32x64xf32> to vector<32x9xf32>
    %103 = vector.extract_strided_slice %101 {offsets = [0, 0], sizes = [32, 55], strides = [1, 1]} : vector<32x64xf32> to vector<32x55xf32>
    %104 = tpu.concatenate %102, %103 in 1 : vector<32x9xf32>, vector<32x55xf32> -> vector<32x64xf32>
    %105 = vector.extract_strided_slice %6 {offsets = [0, 0], sizes = [1, 64], strides = [1, 1]} : vector<9x64xf32> to vector<1x64xf32>
    %106 = vector.broadcast %105 : vector<1x64xf32> to vector<32x64xf32>
    %107 = arith.mulf %104, %106 : vector<32x64xf32>
    %108 = vector.extract_strided_slice %101 {offsets = [0, 56], sizes = [32, 8], strides = [1, 1]} : vector<32x64xf32> to vector<32x8xf32>
    %109 = vector.extract_strided_slice %101 {offsets = [0, 0], sizes = [32, 56], strides = [1, 1]} : vector<32x64xf32> to vector<32x56xf32>
    %110 = tpu.concatenate %108, %109 in 1 : vector<32x8xf32>, vector<32x56xf32> -> vector<32x64xf32>
    %111 = vector.extract_strided_slice %6 {offsets = [1, 0], sizes = [1, 64], strides = [1, 1]} : vector<9x64xf32> to vector<1x64xf32>
    %112 = vector.broadcast %111 : vector<1x64xf32> to vector<32x64xf32>
    %113 = arith.mulf %110, %112 : vector<32x64xf32>
    %114 = vector.extract_strided_slice %101 {offsets = [0, 57], sizes = [32, 7], strides = [1, 1]} : vector<32x64xf32> to vector<32x7xf32>
    %115 = vector.extract_strided_slice %101 {offsets = [0, 0], sizes = [32, 57], strides = [1, 1]} : vector<32x64xf32> to vector<32x57xf32>
    %116 = tpu.concatenate %114, %115 in 1 : vector<32x7xf32>, vector<32x57xf32> -> vector<32x64xf32>
    %117 = vector.extract_strided_slice %6 {offsets = [2, 0], sizes = [1, 64], strides = [1, 1]} : vector<9x64xf32> to vector<1x64xf32>
    %118 = vector.broadcast %117 : vector<1x64xf32> to vector<32x64xf32>
    %119 = arith.mulf %116, %118 : vector<32x64xf32>
    %120 = vector.extract_strided_slice %101 {offsets = [0, 63], sizes = [32, 1], strides = [1, 1]} : vector<32x64xf32> to vector<32x1xf32>
    %121 = vector.extract_strided_slice %101 {offsets = [0, 0], sizes = [32, 63], strides = [1, 1]} : vector<32x64xf32> to vector<32x63xf32>
    %122 = tpu.concatenate %120, %121 in 1 : vector<32x1xf32>, vector<32x63xf32> -> vector<32x64xf32>
    %123 = vector.extract_strided_slice %6 {offsets = [3, 0], sizes = [1, 64], strides = [1, 1]} : vector<9x64xf32> to vector<1x64xf32>
    %124 = vector.broadcast %123 : vector<1x64xf32> to vector<32x64xf32>
    %125 = arith.mulf %122, %124 : vector<32x64xf32>
    %126 = vector.extract_strided_slice %6 {offsets = [4, 0], sizes = [1, 64], strides = [1, 1]} : vector<9x64xf32> to vector<1x64xf32>
    %127 = vector.broadcast %126 : vector<1x64xf32> to vector<32x64xf32>
    %128 = arith.mulf %101, %127 : vector<32x64xf32>
    %129 = vector.extract_strided_slice %101 {offsets = [0, 1], sizes = [32, 63], strides = [1, 1]} : vector<32x64xf32> to vector<32x63xf32>
    %130 = vector.extract_strided_slice %101 {offsets = [0, 0], sizes = [32, 1], strides = [1, 1]} : vector<32x64xf32> to vector<32x1xf32>
    %131 = tpu.concatenate %129, %130 in 1 : vector<32x63xf32>, vector<32x1xf32> -> vector<32x64xf32>
    %132 = vector.extract_strided_slice %6 {offsets = [5, 0], sizes = [1, 64], strides = [1, 1]} : vector<9x64xf32> to vector<1x64xf32>
    %133 = vector.broadcast %132 : vector<1x64xf32> to vector<32x64xf32>
    %134 = arith.mulf %131, %133 : vector<32x64xf32>
    %135 = vector.extract_strided_slice %101 {offsets = [0, 7], sizes = [32, 57], strides = [1, 1]} : vector<32x64xf32> to vector<32x57xf32>
    %136 = vector.extract_strided_slice %101 {offsets = [0, 0], sizes = [32, 7], strides = [1, 1]} : vector<32x64xf32> to vector<32x7xf32>
    %137 = tpu.concatenate %135, %136 in 1 : vector<32x57xf32>, vector<32x7xf32> -> vector<32x64xf32>
    %138 = vector.extract_strided_slice %6 {offsets = [6, 0], sizes = [1, 64], strides = [1, 1]} : vector<9x64xf32> to vector<1x64xf32>
    %139 = vector.broadcast %138 : vector<1x64xf32> to vector<32x64xf32>
    %140 = arith.mulf %137, %139 : vector<32x64xf32>
    %141 = vector.extract_strided_slice %101 {offsets = [0, 8], sizes = [32, 56], strides = [1, 1]} : vector<32x64xf32> to vector<32x56xf32>
    %142 = vector.extract_strided_slice %101 {offsets = [0, 0], sizes = [32, 8], strides = [1, 1]} : vector<32x64xf32> to vector<32x8xf32>
    %143 = tpu.concatenate %141, %142 in 1 : vector<32x56xf32>, vector<32x8xf32> -> vector<32x64xf32>
    %144 = vector.extract_strided_slice %6 {offsets = [7, 0], sizes = [1, 64], strides = [1, 1]} : vector<9x64xf32> to vector<1x64xf32>
    %145 = vector.broadcast %144 : vector<1x64xf32> to vector<32x64xf32>
    %146 = arith.mulf %143, %145 : vector<32x64xf32>
    %147 = vector.extract_strided_slice %101 {offsets = [0, 9], sizes = [32, 55], strides = [1, 1]} : vector<32x64xf32> to vector<32x55xf32>
    %148 = vector.extract_strided_slice %101 {offsets = [0, 0], sizes = [32, 9], strides = [1, 1]} : vector<32x64xf32> to vector<32x9xf32>
    %149 = tpu.concatenate %147, %148 in 1 : vector<32x55xf32>, vector<32x9xf32> -> vector<32x64xf32>
    %150 = vector.extract_strided_slice %6 {offsets = [8, 0], sizes = [1, 64], strides = [1, 1]} : vector<9x64xf32> to vector<1x64xf32>
    %151 = vector.broadcast %150 : vector<1x64xf32> to vector<32x64xf32>
    %152 = arith.mulf %149, %151 : vector<32x64xf32>
    %153 = tpu.concatenate %107, %113, %119, %125, %128, %134, %140, %146, %152 in 0 : vector<32x64xf32>, vector<32x64xf32>, vector<32x64xf32>, vector<32x64xf32>, vector<32x64xf32>, vector<32x64xf32>, vector<32x64xf32>, vector<32x64xf32>, vector<32x64xf32> -> vector<288x64xf32>
    %154 = arith.truncf %153 : vector<288x64xf32> to vector<288x64xbf16>
    %cst_33 = arith.constant dense<0.000000e+00> : vector<8x64xf32>
    %155 = tpu.matmul %1, %154, %cst_33 {dimension_numbers = #tpu.dot_dimension_numbers<[1], [0], [0], [1], [0, 0, 1, 1], [], []>} : vector<8x288xbf16>, vector<288x64xbf16>, vector<8x64xf32> -> vector<8x64xf32>
    %c1_34 = arith.constant 1 : index
    %c0_35 = arith.constant 0 : index
    %c0_36 = arith.constant 0 : index
    %156 = vector.load %arg10[%c1_34, %c0_35, %c0_36] : memref<2x8x64xf32, #tpu.memory_space<vmem>>, vector<1x8x64xf32>
    %157 = vector.shape_cast %156 : vector<1x8x64xf32> to vector<8x64xf32>
    %158 = vector.shape_cast %155 : vector<8x64xf32> to vector<1x8x64xf32>
    tpu.vector_store %arg10[%c1_34, %c0_35, %c0_36], %158 {strides = array<i32>} : memref<2x8x64xf32, #tpu.memory_space<vmem>>, vector<1x8x64xf32>,
    return
  }
  func.func @transform_0(%arg0: i32) -> (i32, i32, i32) {
    %c0_i32 = arith.constant 0 : i32
    %c0_i32_0 = arith.constant 0 : i32
    %c0_i32_1 = arith.constant 0 : i32
    return %arg0, %c0_i32, %c0_i32_0 : i32, i32, i32
  }
  func.func @transform_1(%arg0: i32) -> (i32, i32, i32) {
    %c0_i32 = arith.constant 0 : i32
    %c0_i32_0 = arith.constant 0 : i32
    %c0_i32_1 = arith.constant 0 : i32
    return %arg0, %c0_i32, %c0_i32_0 : i32, i32, i32
  }
  func.func @transform_2(%arg0: i32) -> (i32, i32) {
    %c0_i32 = arith.constant 0 : i32
    %c0_i32_0 = arith.constant 0 : i32
    %c0_i32_1 = arith.constant 0 : i32
    return %c0_i32, %c0_i32_0 : i32, i32
  }
  func.func @transform_3(%arg0: i32) -> (i32, i32) {
    %c0_i32 = arith.constant 0 : i32
    %c0_i32_0 = arith.constant 0 : i32
    %c0_i32_1 = arith.constant 0 : i32
    return %c0_i32, %c0_i32_0 : i32, i32
  }
  func.func @transform_4(%arg0: i32) -> (i32, i32) {
    %c0_i32 = arith.constant 0 : i32
    %c0_i32_0 = arith.constant 0 : i32
    %c0_i32_1 = arith.constant 0 : i32
    return %c0_i32, %c0_i32_0 : i32, i32
  }
  func.func @transform_5(%arg0: i32) -> (i32, i32) {
    %c0_i32 = arith.constant 0 : i32
    %c0_i32_0 = arith.constant 0 : i32
    %c0_i32_1 = arith.constant 0 : i32
    return %c0_i32, %c0_i32_0 : i32, i32
  }
  func.func @transform_6(%arg0: i32) -> (i32, i32) {
    %c0_i32 = arith.constant 0 : i32
    %c0_i32_0 = arith.constant 0 : i32
    %c0_i32_1 = arith.constant 0 : i32
    return %c0_i32, %c0_i32_0 : i32, i32
  }
  func.func @transform_7(%arg0: i32) -> (i32, i32) {
    %c0_i32 = arith.constant 0 : i32
    %c0_i32_0 = arith.constant 0 : i32
    %c0_i32_1 = arith.constant 0 : i32
    return %c0_i32, %c0_i32_0 : i32, i32
  }
  func.func @transform_8(%arg0: i32) -> (i32, i32) {
    %c0_i32 = arith.constant 0 : i32
    %c0_i32_0 = arith.constant 0 : i32
    %c0_i32_1 = arith.constant 0 : i32
    return %c0_i32, %c0_i32_0 : i32, i32
  }
  func.func @transform_9(%arg0: i32) -> (i32, i32, i32) {
    %c0_i32 = arith.constant 0 : i32
    %c0_i32_0 = arith.constant 0 : i32
    %c0_i32_1 = arith.constant 0 : i32
    return %arg0, %c0_i32, %c0_i32_0 : i32, i32, i32
  }
}

</mosaic_0001>

<bundles_post_ra>
// kernel: tpu_custom_call.1
= control target key start
LH: loop header
LB: loop body
LE: loop exit
PB: predicated region body
PF: predicated region fallthrough
CT: control target
= control target key end

     0   :  { %v1225_v2 = vmov 0   ;;  %s2038_s0 = inlined_call_operand.vmem [shape: f32[2,8,64], index: 0, kind: input, shape index: {}]   ;;  %s2039_s1 = inlined_call_operand.vmem [shape: f32[2,8,64], index: 1, kind: input, shape index: {}]   ;;  %s2040_s2 = inlined_call_operand.vmem [shape: f32[16,1], index: 2, kind: input, shape index: {}]   ;;  %s2041_s3 = inlined_call_operand.vmem [shape: f32[16,1], index: 3, kind: input, shape index: {}]   ;;  %s2042_s4 = inlined_call_operand.vmem [shape: bf16[32,16], index: 4, kind: input, shape index: {}]   ;;  %s2043_s5 = inlined_call_operand.vmem [shape: f32[32,1], index: 5, kind: input, shape index: {}]   ;;  %s2044_s6 = inlined_call_operand.vmem [shape: f32[32,1], index: 6, kind: input, shape index: {}]   ;;  %s2045_s7 = inlined_call_operand.vmem [shape: bf16[8,288], index: 7, kind: input, shape index: {}]   ;;  %s2046_s8 = inlined_call_operand.vmem [shape: f32[9,64], index: 8, kind: input, shape index: {}]   ;;  %s2047_s9 = inlined_call_operand.hbm [shape: f32[2,8,64], index: 9, kind: output, shape index: {}]  }
   0x1   :  { %v42_v0 = vld [vmem:[%s2041_s3] sm:$0xff]  ;;  %1195 = vset.pattern.permute.xlu1 %v1225_v2  ;;  %1194 = vset.pattern.permute.xlu0 %v1225_v2  ;;  %v43_v3 = vld [vmem:[%s2041_s3 + $0x8] sm:$0xff] }
   0x2   :  { %v40_v1 = vld [vmem:[%s2040_s2] sm:$0xff]  ;;  %70 = vperm.xlu1 %1195, %v42_v0   ;;  %v41_v4 = vld [vmem:[%s2040_s2 + $0x8] sm:$0xff] }
   0x3   :  { %58 = vperm.xlu0 %1194, %v40_v1   ;;  %v45_v5 = vld [vmem:[%s2043_s5 + $0x8] sm:$0xff]  ;;  %v44_v6 = vld [vmem:[%s2043_s5] sm:$0xff] }
   0x6   :  { %75 = vperm.xlu1 %1195, %v43_v3  }
   0x7   :  { %63 = vperm.xlu0 %1194, %v41_v4  }
   0x8   :  { %14 = vsyncpa [#allocation3], 0  ;;  %v49_v7 = vld [vmem:[%s2044_s6 + $0x8] sm:$0xff]  ;;  %v48_v8 = vld [vmem:[%s2044_s6] sm:$0xff]  ;;  %vm93_vm0 = vcmask 130048   ;;  %v234_v32 = vlaneseq  ;;  %s1226_s17 = smov 119  }
   0x9   :  { %v47_v9 = vld [vmem:[%s2043_s5 + $0x18] sm:$0xff]  ;;  %v46_v10 = vld [vmem:[%s2043_s5 + $0x10] sm:$0xff]  ;;  %v1329_v11 = vld [vmem:[%s2042_s4] sm:$0xff]   ;;  %v1227_v57 = vmov 0.0   ;;  %s1228_s18 = smov 55   ;;  %vm1229_vm1 = vmmov 0  }
   0xa   :  { %156 = vperm.xlu1 %1195, %v45_v5   ;;  %1147 = vmatprep.mubr.msk.bf16.mxu1 %vm93_vm0, %v1329_v11  ;;  %v51_v12 = vld [vmem:[%s2044_s6 + $0x18] sm:$0xff]  ;;  %v50_v13 = vld [vmem:[%s2044_s6 + $0x10] sm:$0xff]  ;;  %v54_v14 = vld [vmem:[%s2038_s0] sm:$0xff]  ;;  %v1376_v35 = vshrl.u32 %v234_v32, 7  ;;  %s1230_s19 = smov 73   ;;  %s1231_s20 = smov 9  }
   0xb   :  { %151 = vperm.xlu0 %1194, %v44_v6   ;;  %v55_v18 = vld [vmem:[%s2039_s1] sm:$0xff]  ;;  %v1360_v27 = vld [vmem:[%s2042_s4 + $0x8] sm:$0xff]   ;;  %1151 = vmatprep.subr.bf16.mxu0 %v1227_v57  ;;  %s1232_s21 = smov 127   ;;  %s1233_s22 = smov 63   ;;  %vm496_vm2 = vcmask 449536   ;;  %vm537_vm3 = vcmask 261120  }
   0xc   :  { %v355_v42 = vsub.s32 4, %v1376_v35  ;;  %v1388_v46 = vld [vmem:[%s2046_s8] sm:$0xff]  ;;  %1155 = vmatprep.mubr.msk.bf16.mxu0 %vm1229_vm1, %v1227_v57  ;;  %s1234_s3 = smov 72   ;;  %s1235_s23 = smov 8   ;;  %v1085_v63 = vld [vmem:[%s2039_s1 + $0x8] sm:$0xff]  ;;  %vm229_vm4 = vcmask 72704  }
   0xd   :  { %s1236_s2 = smov 121   ;;  %s1237_s24 = smov 57   ;;  %v1084_v1 = vld [vmem:[%s2038_s0 + $0x8] sm:$0xff]  ;;  %v1546_v4 = vld [vmem:[%s2045_s7] sm:$0xff]  ;;  %vm385_vm5 = vcmask 515072   ;;  %vm266_vm6 = vcmask 64512  }
   0xe   :  { %180 = vperm.xlu1 %1195, %v49_v7   ;;  %v1401_v54 = vrot.slane %v1388_v46, %v355_v42  ;;  %s1238_s25 = smov 71   ;;  %s1239_s26 = smov 7   ;;  %v1081_v6 = vcombine.high %v1546_v4, %v1546_v4  ;;  %vm422_vm7 = vcmask 465920   ;;  %vm303_vm8 = vcmask 56320  }
   0xf   :  { %175 = vperm.xlu0 %1194, %v48_v8   ;;  %s1240_s27 = smov 120   ;;  %s1241_s28 = smov 56   ;;  %v1556_v8 = vld [vmem:[%s2046_s8 + $0x8] ss:$0 sm:$0xff]  ;;  %vm459_vm9 = vcmask 457728   ;;  %vm340_vm10 = vcmask 7168  }
  0x10   :  { %s1242_s29 = smov 65   ;;  %s1243_s30 = smov 1   ;;  %vm621_vm11 = vcmask 523264  }
  0x12   :  { %166 = vperm.xlu1 %1195, %v47_v9  }
  0x13   :  { %161 = vperm.xlu0 %1194, %v46_v10  }
  0x16   :  { %190 = vperm.xlu1 %1195, %v51_v12  }
  0x17   :  { %185 = vperm.xlu0 %1194, %v50_v13  }
  0x81   :  { %v1342_v15 = vpop.permute.xlu1 %70 }
  0x82   :  { %v1344_v16 = vpop.permute.xlu0 %58 }
  0x83   :  { %v66_v17 = vmul.f32 %v1344_v16, %v54_v14  ;;  %v627_v7 = vmul.f32 %v1084_v1, %v1344_v16 }
  0x85   :  { %v78_v21 = vadd.f32 %v1342_v15, %v66_v17  ;;  %v1354_v22 = vpop.permute.xlu1 %75 }
  0x86   :  { %v1350_v19 = vpop.permute.xlu0 %63 }
  0x87   :  { %v67_v20 = vmul.f32 %v1350_v19, %v55_v18  ;;  %v80_v24 = vmax.f32 %v78_v21, 0.0  ;;  %v628_v3 = vmul.f32 %v1085_v63, %v1350_v19  ;;  %v629_v18 = vadd.f32 %v627_v7, %v1342_v15  ;;  %v1576_v15 = vld [vmem:[%s2045_s7 + $0x8] ss:$0 sps:$4 sm:$0xff]   ;;  %s1244_s7 = smov [#allocation2]  }
  0x88   :  { %v236_v7 = vsub.s32 0, %v1376_v35  ;;  %s1064_s15 = sshll.u32 %s1244_s7, 4  ;;  %s1065_s15 = int_to_ptr.vmem [resolvable:$true] %s1064_s15 }
  0x89   :  { %v79_v23 = vadd.f32 %v1354_v22, %v67_v20  ;;  %v1366_v29 = vpop.permute.xlu1 %156  ;;  %v630_v12 = vadd.f32 %v628_v3, %v1354_v22  ;;  %v631_v32 = vmax.f32 %v629_v18, 0.0  ;;  %s1201_s4 = scalar_lea.vmem %s1065_s15, 256  ;;  %p1206_p1 = scmp.lt.s32.totalorder %s1065_s15, %s1065_s15 }
  0x8a   :  { %v1364_v28 = vpop.permute.xlu0 %151  ;;  %p1202_p0 = scmp.ne.s32.totalorder %s1065_s15, %s1201_s4  ;;  %p1207_p2 = scmp.lt.s32.totalorder %s1201_s4, %s1201_s4 }
  0x8b   :  { %v81_v25 = vmax.f32 %v79_v23, 0.0 }
  0x8c   :  { %p1208_p3 = por %p1207_p2, %p1206_p1 }
  0x8d   :  { %v82_v26 = vpack.c.bf16 %v81_v25, %v80_v24  ;;  %v1370_v31 = vpop.permute.xlu1 %180  ;;  %v632_v24 = vmax.f32 %v630_v12, 0.0  ;;  %v1616_v12 = vrot.slane %v1388_v46, %v236_v7 }
  0x8e   :  { %v1368_v30 = vpop.permute.xlu0 %175  ;;  %p1209_p4 = pnand %p1208_p3, %p1202_p0 }
  0x8f   :  { %1145 = vmatprep.subr.bf16.mxu1 %v82_v26 }
  0x90   :  { %1146 = vmatpush3.bf16.msra.mxu1 %v82_v26 }
  0x91   :  { %v1374_v34 = vpop.permute.xlu1 %166 }
  0x92   :  { %v1372_v33 = vpop.permute.xlu0 %161 }
  0x93   :  { %1148 = vmatmul.mubr.msk.bf16.vlgmr.msra.gmra.mrb[0].mxu1 %vm93_vm0, %v1360_v27 }
  0x94   :  { %573 = vmatprep.mubr.bf16.mxu1 %v1081_v6 }
  0x95   :  { %v1390_v47 = vpop.permute.xlu1 %190 }
  0x96   :  { %v1379_v39 = vpop.permute.xlu0 %185 }
 0x166   :  { %v1149_v36 = vpop.f32.mrb[0].mxu1 }
 0x167   :  { %v171_v37 = vmul.f32 %v1149_v36, %v1372_v33  ;;  %v134_v38 = vpop.f32.mrb[1].mxu1 }
 0x168   :  { %v169_v40 = vmul.f32 %v1364_v28, %v134_v38  ;;  %v1150_v41 = vpop.f32.mrb[2].mxu1  ;;  %v633_v38 = vpack.c.bf16 %v632_v24, %v631_v32 }
 0x169   :  { %v195_v43 = vadd.f32 %v1379_v39, %v171_v37  ;;  %v172_v44 = vmul.f32 %v1150_v41, %v1374_v34  ;;  %v137_v45 = vpop.f32.mrb[3].mxu1 }
 0x16a   :  { %v193_v48 = vadd.f32 %v1368_v30, %v169_v40  ;;  %v170_v49 = vmul.f32 %v1366_v29, %v137_v45 }
 0x16b   :  { %v1394_v50 = vmax.f32 %v195_v43, 0.0  ;;  %v196_v51 = vadd.f32 %v1390_v47, %v172_v44 }
 0x16c   :  { %v1397_v52 = vmax.f32 %v193_v48, 0.0  ;;  %v194_v53 = vadd.f32 %v1370_v31, %v170_v49 }
 0x16d   :  { %v1403_v55 = vmax.f32 %v196_v51, 0.0  ;;  %476 = vrot.lane.b32.xlu0 %v1394_v50, %s1226_s17 }
 0x16e   :  { %v1407_v56 = vmax.f32 %v194_v53, 0.0  ;;  %v357_v58 = vmul.f32 %v1401_v54, %v1397_v52 }
 0x16f   :  { %478 = vrot.lane.b32.xlu1 %v1403_v55, %s1226_s17 }
 0x170   :  { %v358_v59 = vmul.f32 %v1401_v54, %v1407_v56 }
 0x171   :  { %472 = vrot.lane.b32.xlu0 %v1397_v52, %s1226_s17 }
 0x172   :  { %v517_v60 = vpack.c.bf16 %v358_v59, %v357_v58 }
 0x173   :  { %474 = vrot.lane.b32.xlu1 %v1407_v56, %s1226_s17 }
 0x174   :  { %1092 = vmatprep.subr.bf16.mxu1 %v517_v60 }
 0x175   :  { %484 = vrot.lane.b32.xlu0 %v1397_v52, %s1228_s18 }
 0x177   :  { %486 = vrot.lane.b32.xlu1 %v1407_v56, %s1228_s18 }
 0x179   :  { %488 = vrot.lane.b32.xlu0 %v1394_v50, %s1228_s18 }
 0x17b   :  { %490 = vrot.lane.b32.xlu1 %v1403_v55, %s1228_s18 }
 0x17d   :  { %205 = vrot.lane.b32.xlu0 %v1397_v52, %s1230_s19 }
 0x17f   :  { %211 = vrot.lane.b32.xlu1 %v1403_v55, %s1230_s19 }
 0x181   :  { %217 = vrot.lane.b32.xlu0 %v1397_v52, %s1231_s20 }
 0x183   :  { %223 = vrot.lane.b32.xlu1 %v1403_v55, %s1231_s20 }
 0x185   :  { %209 = vrot.lane.b32.xlu0 %v1394_v50, %s1230_s19 }
 0x187   :  { %367 = vrot.lane.b32.xlu1 %v1403_v55, %s1232_s21 }
 0x189   :  { %221 = vrot.lane.b32.xlu0 %v1394_v50, %s1231_s20 }
 0x18b   :  { %379 = vrot.lane.b32.xlu1 %v1403_v55, %s1233_s22 }
 0x18d   :  { %361 = vrot.lane.b32.xlu0 %v1397_v52, %s1232_s21 }
 0x18f   :  { %248 = vrot.lane.b32.xlu1 %v1403_v55, %s1234_s3 }
 0x191   :  { %373 = vrot.lane.b32.xlu0 %v1397_v52, %s1233_s22 }
 0x193   :  { %260 = vrot.lane.b32.xlu1 %v1403_v55, %s1235_s23 }
 0x195   :  { %242 = vrot.lane.b32.xlu0 %v1397_v52, %s1234_s3 }
 0x197   :  { %404 = vrot.lane.b32.xlu1 %v1403_v55, %s1236_s2 }
 0x199   :  { %254 = vrot.lane.b32.xlu0 %v1397_v52, %s1235_s23 }
 0x19b   :  { %416 = vrot.lane.b32.xlu1 %v1403_v55, %s1237_s24 }
 0x19d   :  { %365 = vrot.lane.b32.xlu0 %v1394_v50, %s1232_s21 }
 0x19f   :  { %285 = vrot.lane.b32.xlu1 %v1403_v55, %s1238_s25 }
 0x1a1   :  { %377 = vrot.lane.b32.xlu0 %v1394_v50, %s1233_s22 }
 0x1a3   :  { %297 = vrot.lane.b32.xlu1 %v1403_v55, %s1239_s26 }
 0x1a5   :  { %246 = vrot.lane.b32.xlu0 %v1394_v50, %s1234_s3 }
 0x1a7   :  { %441 = vrot.lane.b32.xlu1 %v1403_v55, %s1240_s27 }
 0x1a9   :  { %258 = vrot.lane.b32.xlu0 %v1394_v50, %s1235_s23 }
 0x1ab   :  { %453 = vrot.lane.b32.xlu1 %v1403_v55, %s1241_s28 }
 0x1ad   :  { %398 = vrot.lane.b32.xlu0 %v1397_v52, %s1236_s2 }
 0x1af   :  { %322 = vrot.lane.b32.xlu1 %v1403_v55, %s1242_s29 }
 0x1b1   :  { %410 = vrot.lane.b32.xlu0 %v1397_v52, %s1237_s24 }
 0x1b3   :  { %334 = vrot.lane.b32.xlu1 %v1403_v55, %s1243_s30 }
 0x1b5   :  { %279 = vrot.lane.b32.xlu0 %v1397_v52, %s1238_s25 }
 0x1b7   :  { %207 = vrot.lane.b32.xlu1 %v1407_v56, %s1230_s19 }
 0x1b9   :  { %291 = vrot.lane.b32.xlu0 %v1397_v52, %s1239_s26 }
 0x1bb   :  { %219 = vrot.lane.b32.xlu1 %v1407_v56, %s1231_s20 }
 0x1bd   :  { %402 = vrot.lane.b32.xlu0 %v1394_v50, %s1236_s2 }
 0x1bf   :  { %363 = vrot.lane.b32.xlu1 %v1407_v56, %s1232_s21 }
 0x1c1   :  { %414 = vrot.lane.b32.xlu0 %v1394_v50, %s1237_s24 }
 0x1c3   :  { %375 = vrot.lane.b32.xlu1 %v1407_v56, %s1233_s22 }
 0x1c5   :  { %283 = vrot.lane.b32.xlu0 %v1394_v50, %s1238_s25 }
 0x1c7   :  { %244 = vrot.lane.b32.xlu1 %v1407_v56, %s1234_s3 }
 0x1c9   :  { %295 = vrot.lane.b32.xlu0 %v1394_v50, %s1239_s26 }
 0x1cb   :  { %256 = vrot.lane.b32.xlu1 %v1407_v56, %s1235_s23 }
 0x1cd   :  { %435 = vrot.lane.b32.xlu0 %v1397_v52, %s1240_s27 }
 0x1cf   :  { %400 = vrot.lane.b32.xlu1 %v1407_v56, %s1236_s2 }
 0x1d1   :  { %447 = vrot.lane.b32.xlu0 %v1397_v52, %s1241_s28 }
 0x1d3   :  { %412 = vrot.lane.b32.xlu1 %v1407_v56, %s1237_s24 }
 0x1d5   :  { %316 = vrot.lane.b32.xlu0 %v1397_v52, %s1242_s29 }
 0x1d7   :  { %281 = vrot.lane.b32.xlu1 %v1407_v56, %s1238_s25 }
 0x1d9   :  { %328 = vrot.lane.b32.xlu0 %v1397_v52, %s1243_s30 }
 0x1db   :  { %293 = vrot.lane.b32.xlu1 %v1407_v56, %s1239_s26 }
 0x1dd   :  { %439 = vrot.lane.b32.xlu0 %v1394_v50, %s1240_s27 }
 0x1df   :  { %v477_v61 = vpop.permute.xlu0 %476  ;;  %437 = vrot.lane.b32.xlu1 %v1407_v56, %s1240_s27 }
 0x1e1   :  { %451 = vrot.lane.b32.xlu0 %v1394_v50, %s1241_s28  ;;  %v479_v62 = vpop.permute.xlu1 %478 }
 0x1e3   :  { %v473_v0 = vpop.permute.xlu0 %472  ;;  %449 = vrot.lane.b32.xlu1 %v1407_v56, %s1241_s28 }
 0x1e5   :  { %320 = vrot.lane.b32.xlu0 %v1394_v50, %s1242_s29  ;;  %v475_v2 = vpop.permute.xlu1 %474 }
 0x1e7   :  { %v485_v5 = vpop.permute.xlu0 %484  ;;  %318 = vrot.lane.b32.xlu1 %v1407_v56, %s1242_s29 }
 0x1e8   :  { %v497_v9 = vsel %vm496_vm2, %v473_v0, %v485_v5 }
 0x1e9   :  { %332 = vrot.lane.b32.xlu0 %v1394_v50, %s1243_s30  ;;  %v487_v10 = vpop.permute.xlu1 %486  ;;  %v505_v14 = vmul.f32 %v1556_v8, %v497_v9 }
 0x1ea   :  { %v498_v13 = vsel %vm496_vm2, %v475_v2, %v487_v10 }
 0x1eb   :  { %v506_v16 = vmul.f32 %v1556_v8, %v498_v13  ;;  %v489_v17 = vpop.permute.xlu0 %488  ;;  %330 = vrot.lane.b32.xlu1 %v1407_v56, %s1243_s30 }
 0x1ec   :  { %v499_v19 = vsel %vm496_vm2, %v477_v61, %v489_v17 }
 0x1ed   :  { %v491_v20 = vpop.permute.xlu1 %490  ;;  %v525_v21 = vpack.c.bf16 %v506_v16, %v505_v14  ;;  %v507_v22 = vmul.f32 %v1556_v8, %v499_v19  ;;  %v360_v19 = vmul.f32 %v1401_v54, %v1403_v55 }
 0x1ee   :  { %v500_v23 = vsel %vm496_vm2, %v479_v62, %v491_v20 }
 0x1ef   :  { %v508_v25 = vmul.f32 %v1556_v8, %v500_v23  ;;  %v206_v26 = vpop.permute.xlu0 %205  ;;  %1152 = vmatpush3.bf16.msra.mxu0 %v525_v21 }
 0x1f0   :  { %1153 = vmatprep.subr.bf16.mxu0 %v1227_v57 }
 0x1f1   :  { %v212_v36 = vpop.permute.xlu1 %211  ;;  %v526_v37 = vpack.c.bf16 %v508_v25, %v507_v22  ;;  %v359_v22 = vmul.f32 %v1401_v54, %v1394_v50 }
 0x1f3   :  { %v218_v40 = vpop.permute.xlu0 %217  ;;  %1154 = vmatpush3.bf16.msra.mxu0 %v526_v37 }
 0x1f4   :  { %1159 = vmatprep.subr.bf16.mxu0 %v633_v38  ;;  %v230_v14 = vsel %vm229_vm4, %v206_v26, %v218_v40  ;;  %v392_v26 = vsub.s32 5, %v1376_v35 }
 0x1f5   :  { %v224_v41 = vpop.permute.xlu1 %223  ;;  %v238_v20 = vmul.f32 %v1616_v12, %v230_v14 }
 0x1f6   :  { %1156 = vmatmul.mubr.msk.bf16.vlgmr.msra.gmra.mrb[0].mxu0 %vm537_vm3, %v1576_v15  ;;  %v233_v24 = vsel %vm229_vm4, %v212_v36, %v224_v41  ;;  %v1637_v36 = vrot.slane %v1388_v46, %v392_v26 }
 0x1f7   :  { %v210_v42 = vpop.permute.xlu0 %209  ;;  %1160 = vmatpush3.bf16.msra.mxu0 %v633_v38  ;;  %1161 = vmatprep.mubr.msk.bf16.mxu0 %vm93_vm0, %v1329_v11  ;;  %v518_v38 = vpack.c.bf16 %v360_v19, %v359_v22  ;;  %v241_v55 = vmul.f32 %v1616_v12, %v233_v24 }
 0x1f9   :  { %v1582_v43 = vpop.permute.xlu1 %367 }
 0x1fb   :  { %v222_v44 = vpop.permute.xlu0 %221 }
 0x1fc   :  { %v232_v17 = vsel %vm229_vm4, %v210_v42, %v222_v44 }
 0x1fd   :  { %v1584_v45 = vpop.permute.xlu1 %379  ;;  %v240_v25 = vmul.f32 %v1616_v12, %v232_v17 }
 0x1fe   :  { %1162 = vmatmul.mubr.msk.bf16.vlgmr.msra.gmra.mrb[4].mxu0 %vm93_vm0, %v1360_v27 }
 0x1ff   :  { %v362_v48 = vpop.permute.xlu0 %361  ;;  %1009 = vmatprep.mubr.bf16.mxu0 %v1081_v6  ;;  %v510_v44 = vpack.c.bf16 %v241_v55, %v240_v25 }
 0x201   :  { %v1588_v49 = vpop.permute.xlu1 %248 }
 0x203   :  { %v374_v51 = vpop.permute.xlu0 %373 }
 0x204   :  { %v386_v42 = vsel %vm385_vm5, %v362_v48, %v374_v51 }
 0x205   :  { %v1590_v52 = vpop.permute.xlu1 %260  ;;  %v394_v7 = vmul.f32 %v1637_v36, %v386_v42 }
 0x207   :  { %v243_v53 = vpop.permute.xlu0 %242 }
 0x209   :  { %v1592_v56 = vpop.permute.xlu1 %404 }
 0x20b   :  { %v255_v58 = vpop.permute.xlu0 %254 }
 0x20c   :  { %v267_v19 = vsel %vm266_vm6, %v243_v53, %v255_v58 }
 0x20d   :  { %v1594_v11 = vpop.permute.xlu1 %416 }
 0x20f   :  { %v366_v59 = vpop.permute.xlu0 %365 }
 0x211   :  { %v1596_v60 = vpop.permute.xlu1 %285 }
 0x213   :  { %v378_v61 = vpop.permute.xlu0 %377 }
 0x214   :  { %v388_v48 = vsel %vm385_vm5, %v366_v59, %v378_v61 }
 0x215   :  { %v1598_v62 = vpop.permute.xlu1 %297  ;;  %v396_v22 = vmul.f32 %v1637_v36, %v388_v48 }
 0x217   :  { %v247_v27 = vpop.permute.xlu0 %246 }
 0x219   :  { %v1600_v63 = vpop.permute.xlu1 %441 }
 0x21b   :  { %v259_v0 = vpop.permute.xlu0 %258 }
 0x21c   :  { %v269_v25 = vsel %vm266_vm6, %v247_v27, %v259_v0 }
 0x21d   :  { %v1602_v1 = vpop.permute.xlu1 %453 }
 0x21f   :  { %v1604_v2 = vpop.permute.xlu0 %398 }
 0x221   :  { %v1606_v3 = vpop.permute.xlu1 %322 }
 0x223   :  { %v1608_v5 = vpop.permute.xlu0 %410 }
 0x224   :  { %v423_v42 = vsel %vm422_vm7, %v1604_v2, %v1608_v5 }
 0x225   :  { %v1610_v6 = vpop.permute.xlu1 %334 }
 0x227   :  { %v1613_v9 = vpop.permute.xlu0 %279 }
 0x229   :  { %v208_v10 = vpop.permute.xlu1 %207 }
 0x22b   :  { %v1618_v13 = vpop.permute.xlu0 %291 }
 0x22c   :  { %v304_v48 = vsel %vm303_vm8, %v1613_v9, %v1618_v13 }
 0x22d   :  { %v220_v16 = vpop.permute.xlu1 %219 }
 0x22e   :  { %v231_v18 = vsel %vm229_vm4, %v208_v10, %v220_v16  ;;  %v273_v16 = vsub.s32 1, %v1376_v35 }
 0x22f   :  { %v239_v21 = vmul.f32 %v1616_v12, %v231_v18  ;;  %v1627_v23 = vpop.permute.xlu0 %402 }
 0x231   :  { %v509_v32 = vpack.c.bf16 %v239_v21, %v238_v20  ;;  %v364_v37 = vpop.permute.xlu1 %363  ;;  %v389_v20 = vsel %vm385_vm5, %v1582_v43, %v1584_v45  ;;  %v1649_v21 = vrot.slane %v1388_v46, %v273_v16  ;;  %v270_v43 = vsel %vm266_vm6, %v1588_v49, %v1590_v52 }
 0x232   :  { %v397_v53 = vmul.f32 %v1637_v36, %v389_v20  ;;  %v429_v45 = vsub.s32 6, %v1376_v35  ;;  %v310_v16 = vsub.s32 2, %v1376_v35 }
 0x233   :  { %v415_v40 = vpop.permute.xlu0 %414  ;;  %1093 = vmatpush3.bf16.msra.mxu1 %v509_v32  ;;  %v275_v59 = vmul.f32 %v1649_v21, %v267_v19  ;;  %v277_v58 = vmul.f32 %v1649_v21, %v269_v25  ;;  %v278_v0 = vmul.f32 %v1649_v21, %v270_v43  ;;  %v426_v19 = vsel %vm422_vm7, %v1592_v56, %v1594_v11 }
 0x234   :  { %1094 = vmatprep.subr.bf16.mxu1 %v518_v38  ;;  %v520_v27 = vpack.c.bf16 %v397_v53, %v396_v22  ;;  %v425_v2 = vsel %vm422_vm7, %v1627_v23, %v415_v40  ;;  %v1682_v20 = vrot.slane %v1388_v46, %v310_v16  ;;  %v307_v56 = vsel %vm303_vm8, %v1596_v60, %v1598_v62 }
 0x235   :  { %v376_v50 = vpop.permute.xlu1 %375  ;;  %v512_v49 = vpack.c.bf16 %v278_v0, %v277_v58  ;;  %v466_v11 = vsub.s32 7, %v1376_v35 }
 0x236   :  { %v387_v41 = vsel %vm385_vm5, %v364_v37, %v376_v50  ;;  %v312_v40 = vmul.f32 %v1682_v20, %v304_v48 }
 0x237   :  { %v395_v10 = vmul.f32 %v1637_v36, %v387_v41  ;;  %v284_v14 = vpop.permute.xlu0 %283  ;;  %1095 = vmatpush3.bf16.msra.mxu1 %v510_v44  ;;  %v1667_v44 = vrot.slane %v1388_v46, %v429_v45  ;;  %v1698_v58 = vrot.slane %v1388_v46, %v466_v11 }
 0x239   :  { %v245_v17 = vpop.permute.xlu1 %244  ;;  %v519_v18 = vpack.c.bf16 %v395_v10, %v394_v7  ;;  %v431_v41 = vmul.f32 %v1667_v44, %v423_v42  ;;  %v433_v22 = vmul.f32 %v1667_v44, %v425_v2  ;;  %v434_v9 = vmul.f32 %v1667_v44, %v426_v19 }
 0x23a   :  { %v347_v42 = vsub.s32 3, %v1376_v35 }
 0x23b   :  { %v296_v51 = vpop.permute.xlu0 %295  ;;  %1096 = vmatprep.subr.bf16.mxu1 %v519_v18 }
 0x23c   :  { %v306_v25 = vsel %vm303_vm8, %v284_v14, %v296_v51  ;;  %v522_v14 = vpack.c.bf16 %v434_v9, %v433_v22  ;;  %v315_v51 = vmul.f32 %v1682_v20, %v307_v56  ;;  %v1725_v22 = vcombine.low %v1546_v4, %v1546_v4 }
 0x23d   :  { %v257_v24 = vpop.permute.xlu1 %256  ;;  %v314_v13 = vmul.f32 %v1682_v20, %v306_v25 }
 0x23e   :  { %v268_v26 = vsel %vm266_vm6, %v245_v17, %v257_v24 }
 0x23f   :  { %v276_v61 = vmul.f32 %v1649_v21, %v268_v26  ;;  %v436_v32 = vpop.permute.xlu0 %435 }
 0x241   :  { %v511_v37 = vpack.c.bf16 %v276_v61, %v275_v59  ;;  %v401_v38 = vpop.permute.xlu1 %400 }
 0x243   :  { %v448_v55 = vpop.permute.xlu0 %447  ;;  %1097 = vmatpush3.bf16.msra.mxu1 %v511_v37  ;;  %v514_v37 = vpack.c.bf16 %v315_v51, %v314_v13 }
 0x244   :  { %1098 = vmatprep.subr.bf16.mxu1 %v520_v27  ;;  %v460_v45 = vsel %vm459_vm9, %v436_v32, %v448_v55 }
 0x245   :  { %v413_v52 = vpop.permute.xlu1 %412 }
 0x246   :  { %v424_v50 = vsel %vm422_vm7, %v401_v38, %v413_v52  ;;  %v468_v38 = vmul.f32 %v1698_v58, %v460_v45 }
 0x247   :  { %v432_v7 = vmul.f32 %v1667_v44, %v424_v50  ;;  %v317_v10 = vpop.permute.xlu0 %316  ;;  %1099 = vmatpush3.bf16.msra.mxu1 %v512_v49 }
 0x249   :  { %v282_v17 = vpop.permute.xlu1 %281  ;;  %v521_v18 = vpack.c.bf16 %v432_v7, %v431_v41  ;;  %v463_v41 = vsel %vm459_vm9, %v1600_v63, %v1602_v1  ;;  %v1710_v7 = vrot.slane %v1388_v46, %v347_v42  ;;  %v344_v63 = vsel %vm340_vm10, %v1606_v3, %v1610_v6 }
 0x24b   :  { %v329_v5 = vpop.permute.xlu0 %328  ;;  %1100 = vmatprep.subr.bf16.mxu1 %v521_v18  ;;  %v352_v19 = vmul.f32 %v1710_v7, %v344_v63 }
 0x24c   :  { %v341_v50 = vsel %vm340_vm10, %v317_v10, %v329_v5  ;;  %v471_v10 = vmul.f32 %v1698_v58, %v463_v41 }
 0x24d   :  { %v294_v24 = vpop.permute.xlu1 %293  ;;  %v349_v2 = vmul.f32 %v1710_v7, %v341_v50 }
 0x24e   :  { %v305_v23 = vsel %vm303_vm8, %v282_v17, %v294_v24 }
 0x24f   :  { %v313_v26 = vmul.f32 %v1682_v20, %v305_v23  ;;  %v440_v59 = vpop.permute.xlu0 %439 }
 0x251   :  { %v513_v61 = vpack.c.bf16 %v313_v26, %v312_v40  ;;  %v438_v53 = vpop.permute.xlu1 %437 }
 0x253   :  { %v452_v43 = vpop.permute.xlu0 %451  ;;  %1101 = vmatpush3.bf16.msra.mxu1 %v513_v61 }
 0x254   :  { %1102 = vmatprep.subr.bf16.mxu1 %v522_v14  ;;  %v462_v32 = vsel %vm459_vm9, %v440_v59, %v452_v43 }
 0x255   :  { %v450_v60 = vpop.permute.xlu1 %449  ;;  %v470_v17 = vmul.f32 %v1698_v58, %v462_v32 }
 0x256   :  { %v461_v62 = vsel %vm459_vm9, %v438_v53, %v450_v60 }
 0x257   :  { %v469_v27 = vmul.f32 %v1698_v58, %v461_v62  ;;  %v321_v0 = vpop.permute.xlu0 %320  ;;  %1103 = vmatpush3.bf16.msra.mxu1 %v514_v37  ;;  %v524_v5 = vpack.c.bf16 %v471_v10, %v470_v17 }
 0x259   :  { %v319_v49 = vpop.permute.xlu1 %318  ;;  %v523_v52 = vpack.c.bf16 %v469_v27, %v468_v38 }
 0x25b   :  { %v333_v55 = vpop.permute.xlu0 %332  ;;  %1104 = vmatprep.subr.bf16.mxu1 %v523_v52 }
 0x25c   :  { %v343_v35 = vsel %vm340_vm10, %v321_v0, %v333_v55 }
 0x25d   :  { %v331_v16 = vpop.permute.xlu1 %330  ;;  %v351_v46 = vmul.f32 %v1710_v7, %v343_v35 }
 0x25e   :  { %v342_v18 = vsel %vm340_vm10, %v319_v49, %v331_v16 }
 0x25f   :  { %v350_v48 = vmul.f32 %v1710_v7, %v342_v18  ;;  %v516_v24 = vpack.c.bf16 %v352_v19, %v351_v46 }
 0x261   :  { %v515_v1 = vpack.c.bf16 %v350_v48, %v349_v2 }
 0x263   :  { %1105 = vmatpush3.bf16.msra.mxu1 %v515_v1 }
 0x264   :  { %1106 = vmatprep.subr.bf16.mxu1 %v524_v5 }
 0x267   :  { %1107 = vmatpush3.bf16.msra.mxu1 %v516_v24 }
 0x268   :  { %1165 = vmatprep.subr.bf16.mxu1 %v1227_v57 }
 0x26a   :  { %574 = vmatmul.mubr.bf16.vlgmr.msra.gmra.mrb[4].mxu1 %v1725_v22 }
 0x26b   :  { %1169 = vmatprep.mubr.msk.bf16.mxu1 %vm1229_vm1, %v1227_v57 }
 0x2c9   :  { %v1731_v3 = vpop.f32.mrb[0].mxu0 }
 0x2ca   :  { %v1157_v6 = vpop.f32.mrb[1].mxu0 }
 0x2cb   :  { %v618_v25 = vpop.f32.mrb[2].mxu0 }
 0x2cc   :  { %v1158_v23 = vpop.f32.mrb[3].mxu0 }
 0x2d1   :  { %v1163_v40 = vpop.f32.mrb[4].mxu0 }
 0x2d2   :  { %v685_v26 = vmul.f32 %v1163_v40, %v1372_v33  ;;  %v668_v59 = vpop.f32.mrb[5].mxu0 }
 0x2d3   :  { %v683_v4 = vmul.f32 %v668_v59, %v1364_v28  ;;  %v1164_v9 = vpop.f32.mrb[6].mxu0 }
 0x2d4   :  { %v689_v56 = vadd.f32 %v685_v26, %v1379_v39  ;;  %v686_v11 = vmul.f32 %v1164_v9, %v1374_v34  ;;  %v671_v13 = vpop.f32.mrb[7].mxu0 }
 0x2d5   :  { %v687_v61 = vadd.f32 %v683_v4, %v1368_v30  ;;  %v684_v53 = vmul.f32 %v671_v13, %v1366_v29 }
 0x2d6   :  { %v1739_v14 = vmax.f32 %v689_v56, 0.0  ;;  %v690_v51 = vadd.f32 %v686_v11, %v1390_v47 }
 0x2d7   :  { %v1742_v43 = vmax.f32 %v687_v61, 0.0  ;;  %v688_v33 = vadd.f32 %v684_v53, %v1370_v31 }
 0x2d8   :  { %v1745_v45 = vmax.f32 %v690_v51, 0.0  ;;  %703 = vrot.lane.b32.xlu0 %v1739_v14, %s1230_s19 }
 0x2d9   :  { %v1749_v28 = vmax.f32 %v688_v33, 0.0  ;;  %v827_v29 = vmul.f32 %v1742_v43, %v1401_v54 }
 0x2da   :  { %705 = vrot.lane.b32.xlu1 %v1745_v45, %s1230_s19 }
 0x2db   :  { %v828_v30 = vmul.f32 %v1749_v28, %v1401_v54 }
 0x2dc   :  { %715 = vrot.lane.b32.xlu0 %v1739_v14, %s1231_s20 }
 0x2dd   :  { %v967_v31 = vpack.c.bf16 %v828_v30, %v827_v29 }
 0x2de   :  { %717 = vrot.lane.b32.xlu1 %v1745_v45, %s1231_s20 }
 0x2df   :  { %1120 = vmatprep.subr.bf16.mxu0 %v967_v31 }
 0x2e0   :  { %835 = vrot.lane.b32.xlu0 %v1739_v14, %s1232_s21 }
 0x2e2   :  { %837 = vrot.lane.b32.xlu1 %v1745_v45, %s1232_s21 }
 0x2e4   :  { %847 = vrot.lane.b32.xlu0 %v1739_v14, %s1233_s22 }
 0x2e6   :  { %849 = vrot.lane.b32.xlu1 %v1745_v45, %s1233_s22 }
 0x2e8   :  { %735 = vrot.lane.b32.xlu0 %v1739_v14, %s1234_s3 }
 0x2ea   :  { %737 = vrot.lane.b32.xlu1 %v1745_v45, %s1234_s3 }
 0x2ec   :  { %747 = vrot.lane.b32.xlu0 %v1739_v14, %s1235_s23 }
 0x2ee   :  { %749 = vrot.lane.b32.xlu1 %v1745_v45, %s1235_s23 }
 0x2f0   :  { %867 = vrot.lane.b32.xlu0 %v1739_v14, %s1236_s2 }
 0x2f2   :  { %869 = vrot.lane.b32.xlu1 %v1745_v45, %s1236_s2 }
 0x2f4   :  { %879 = vrot.lane.b32.xlu0 %v1739_v14, %s1237_s24 }
 0x2f6   :  { %881 = vrot.lane.b32.xlu1 %v1745_v45, %s1237_s24 }
 0x2f8   :  { %767 = vrot.lane.b32.xlu0 %v1739_v14, %s1238_s25 }
 0x2fa   :  { %769 = vrot.lane.b32.xlu1 %v1745_v45, %s1238_s25 }
 0x2fc   :  { %779 = vrot.lane.b32.xlu0 %v1739_v14, %s1239_s26 }
 0x2fe   :  { %781 = vrot.lane.b32.xlu1 %v1745_v45, %s1239_s26 }
 0x300   :  { %899 = vrot.lane.b32.xlu0 %v1739_v14, %s1240_s27 }
 0x302   :  { %901 = vrot.lane.b32.xlu1 %v1745_v45, %s1240_s27 }
 0x304   :  { %911 = vrot.lane.b32.xlu0 %v1739_v14, %s1241_s28 }
 0x306   :  { %913 = vrot.lane.b32.xlu1 %v1745_v45, %s1241_s28 }
 0x308   :  { %799 = vrot.lane.b32.xlu0 %v1739_v14, %s1242_s29 }
 0x30a   :  { %801 = vrot.lane.b32.xlu1 %v1745_v45, %s1242_s29 }
 0x30c   :  { %811 = vrot.lane.b32.xlu0 %v1739_v14, %s1243_s30 }
 0x30e   :  { %813 = vrot.lane.b32.xlu1 %v1745_v45, %s1243_s30 }
 0x310   :  { %931 = vrot.lane.b32.xlu0 %v1739_v14, %s1226_s17 }
 0x312   :  { %933 = vrot.lane.b32.xlu1 %v1745_v45, %s1226_s17 }
 0x314   :  { %699 = vrot.lane.b32.xlu0 %v1742_v43, %s1230_s19 }
 0x316   :  { %701 = vrot.lane.b32.xlu1 %v1749_v28, %s1230_s19 }
 0x318   :  { %711 = vrot.lane.b32.xlu0 %v1742_v43, %s1231_s20 }
 0x31a   :  { %713 = vrot.lane.b32.xlu1 %v1749_v28, %s1231_s20 }
 0x31c   :  { %831 = vrot.lane.b32.xlu0 %v1742_v43, %s1232_s21 }
 0x31e   :  { %833 = vrot.lane.b32.xlu1 %v1749_v28, %s1232_s21 }
 0x320   :  { %843 = vrot.lane.b32.xlu0 %v1742_v43, %s1233_s22 }
 0x322   :  { %845 = vrot.lane.b32.xlu1 %v1749_v28, %s1233_s22 }
 0x324   :  { %731 = vrot.lane.b32.xlu0 %v1742_v43, %s1234_s3 }
 0x326   :  { %733 = vrot.lane.b32.xlu1 %v1749_v28, %s1234_s3 }
 0x328   :  { %743 = vrot.lane.b32.xlu0 %v1742_v43, %s1235_s23 }
 0x32a   :  { %745 = vrot.lane.b32.xlu1 %v1749_v28, %s1235_s23 }
 0x32c   :  { %863 = vrot.lane.b32.xlu0 %v1742_v43, %s1236_s2 }
 0x32e   :  { %865 = vrot.lane.b32.xlu1 %v1749_v28, %s1236_s2 }
 0x330   :  { %875 = vrot.lane.b32.xlu0 %v1742_v43, %s1237_s24 }
 0x332   :  { %877 = vrot.lane.b32.xlu1 %v1749_v28, %s1237_s24 }
 0x334   :  { %763 = vrot.lane.b32.xlu0 %v1742_v43, %s1238_s25 }
 0x336   :  { %765 = vrot.lane.b32.xlu1 %v1749_v28, %s1238_s25 }
 0x338   :  { %775 = vrot.lane.b32.xlu0 %v1742_v43, %s1239_s26 }
 0x33a   :  { %777 = vrot.lane.b32.xlu1 %v1749_v28, %s1239_s26 }
 0x33c   :  { %895 = vrot.lane.b32.xlu0 %v1742_v43, %s1240_s27 }
 0x33d   :  { %v1108_v34 = vpop.f32.mrb[4].mxu1 }
 0x33e   :  { %897 = vrot.lane.b32.xlu1 %v1749_v28, %s1240_s27  ;;  %v1109_v39 = vpop.f32.mrb[5].mxu1 }
 0x33f   :  { %v1110_v47 = vadd.f32 %v1109_v39, %v1108_v34  ;;  %v1111_v37 = vpop.f32.mrb[6].mxu1 }
 0x340   :  { %907 = vrot.lane.b32.xlu0 %v1742_v43, %s1241_s28  ;;  %v1112_v60 = vpop.f32.mrb[7].mxu1 }
 0x341   :  { %v616_v62 = vadd.f32 %v1110_v47, %v1731_v3 }
 0x342   :  { %909 = vrot.lane.b32.xlu1 %v1749_v28, %s1241_s28 }
 0x343   :  { %622 = vst.msk [vmem:[#allocation2] sm:$0xff] %vm621_vm11, %v616_v62 }
 0x344   :  { %795 = vrot.lane.b32.xlu0 %v1742_v43, %s1242_s29 }
 0x346   :  { %797 = vrot.lane.b32.xlu1 %v1749_v28, %s1242_s29 }
 0x348   :  { %807 = vrot.lane.b32.xlu0 %v1742_v43, %s1243_s30 }
 0x34a   :  { %v704_v38 = vpop.permute.xlu0 %703  ;;  %809 = vrot.lane.b32.xlu1 %v1749_v28, %s1243_s30 }
 0x34c   :  { %927 = vrot.lane.b32.xlu0 %v1742_v43, %s1226_s17  ;;  %v706_v27 = vpop.permute.xlu1 %705 }
 0x34e   :  { %v716_v0 = vpop.permute.xlu0 %715  ;;  %929 = vrot.lane.b32.xlu1 %v1749_v28, %s1226_s17 }
 0x34f   :  { %v725_v42 = vsel %vm229_vm4, %v704_v38, %v716_v0 }
 0x350   :  { %939 = vrot.lane.b32.xlu0 %v1742_v43, %s1228_s18  ;;  %v718_v49 = vpop.permute.xlu1 %717  ;;  %v1880_v32 = vmul.f32 %v725_v42, %v1616_v12 }
 0x351   :  { %v726_v52 = vsel %vm229_vm4, %v706_v27, %v718_v49 }
 0x352   :  { %v1883_v55 = vmul.f32 %v726_v52, %v1616_v12  ;;  %v836_v50 = vpop.permute.xlu0 %835  ;;  %941 = vrot.lane.b32.xlu1 %v1749_v28, %s1228_s18 }
 0x354   :  { %v960_v41 = vpack.c.bf16 %v1883_v55, %v1880_v32  ;;  %943 = vrot.lane.b32.xlu0 %v1739_v14, %s1228_s18  ;;  %v838_v16 = vpop.permute.xlu1 %837 }
 0x356   :  { %v848_v17 = vpop.permute.xlu0 %847  ;;  %945 = vrot.lane.b32.xlu1 %v1745_v45, %s1228_s18 }
 0x357   :  { %v857_v35 = vsel %vm385_vm5, %v836_v50, %v848_v17 }
 0x358   :  { %v850_v18 = vpop.permute.xlu1 %849  ;;  %v1896_v48 = vmul.f32 %v857_v35, %v1637_v36 }
 0x359   :  { %v858_v2 = vsel %vm385_vm5, %v838_v16, %v850_v18 }
 0x35a   :  { %v1899_v10 = vmul.f32 %v858_v2, %v1637_v36  ;;  %v736_v63 = vpop.permute.xlu0 %735 }
 0x35c   :  { %v738_v46 = vpop.permute.xlu1 %737  ;;  %v970_v1 = vpack.c.bf16 %v1899_v10, %v1896_v48 }
 0x35e   :  { %v748_v5 = vpop.permute.xlu0 %747 }
 0x35f   :  { %v757_v19 = vsel %vm266_vm6, %v736_v63, %v748_v5 }
 0x360   :  { %v750_v24 = vpop.permute.xlu1 %749  ;;  %v1906_v6 = vmul.f32 %v757_v19, %v1649_v21 }
 0x361   :  { %v758_v3 = vsel %vm266_vm6, %v738_v46, %v750_v24 }
 0x362   :  { %v1909_v25 = vmul.f32 %v758_v3, %v1649_v21  ;;  %v868_v23 = vpop.permute.xlu0 %867 }
 0x364   :  { %v962_v40 = vpack.c.bf16 %v1909_v25, %v1906_v6  ;;  %v870_v26 = vpop.permute.xlu1 %869 }
 0x366   :  { %v880_v59 = vpop.permute.xlu0 %879 }
 0x367   :  { %v889_v4 = vsel %vm422_vm7, %v868_v23, %v880_v59 }
 0x368   :  { %v882_v9 = vpop.permute.xlu1 %881  ;;  %v1916_v11 = vmul.f32 %v889_v4, %v1667_v44  ;;  %v830_v4 = vmul.f32 %v1745_v45, %v1401_v54 }
 0x369   :  { %v890_v56 = vsel %vm422_vm7, %v870_v26, %v882_v9 }
 0x36a   :  { %v1919_v13 = vmul.f32 %v890_v56, %v1667_v44  ;;  %v768_v61 = vpop.permute.xlu0 %767 }
 0x36c   :  { %v770_v53 = vpop.permute.xlu1 %769  ;;  %v972_v51 = vpack.c.bf16 %v1919_v13, %v1916_v11 }
 0x36e   :  { %v780_v43 = vpop.permute.xlu0 %779 }
 0x36f   :  { %v789_v33 = vsel %vm303_vm8, %v768_v61, %v780_v43 }
 0x370   :  { %v782_v28 = vpop.permute.xlu1 %781  ;;  %v1926_v30 = vmul.f32 %v789_v33, %v1682_v20 }
 0x371   :  { %v790_v29 = vsel %vm303_vm8, %v770_v53, %v782_v28  ;;  %v829_v53 = vmul.f32 %v1739_v14, %v1401_v54 }
 0x372   :  { %v1929_v31 = vmul.f32 %v790_v29, %v1682_v20  ;;  %v900_v34 = vpop.permute.xlu0 %899 }
 0x373   :  { %v968_v28 = vpack.c.bf16 %v830_v4, %v829_v53 }
 0x374   :  { %v964_v39 = vpack.c.bf16 %v1929_v31, %v1926_v30  ;;  %v902_v47 = vpop.permute.xlu1 %901 }
 0x376   :  { %v912_v37 = vpop.permute.xlu0 %911 }
 0x377   :  { %v921_v60 = vsel %vm459_vm9, %v900_v34, %v912_v37 }
 0x378   :  { %v914_v62 = vpop.permute.xlu1 %913  ;;  %v1936_v27 = vmul.f32 %v921_v60, %v1698_v58 }
 0x379   :  { %v922_v38 = vsel %vm459_vm9, %v902_v47, %v914_v62 }
 0x37a   :  { %v1939_v0 = vmul.f32 %v922_v38, %v1698_v58  ;;  %v800_v42 = vpop.permute.xlu0 %799 }
 0x37c   :  { %v802_v49 = vpop.permute.xlu1 %801  ;;  %v974_v52 = vpack.c.bf16 %v1939_v0, %v1936_v27 }
 0x37e   :  { %v812_v50 = vpop.permute.xlu0 %811 }
 0x37f   :  { %v821_v16 = vsel %vm340_vm10, %v800_v42, %v812_v50 }
 0x380   :  { %v814_v17 = vpop.permute.xlu1 %813  ;;  %v1946_v18 = vmul.f32 %v821_v16, %v1710_v7 }
 0x381   :  { %v822_v35 = vsel %vm340_vm10, %v802_v49, %v814_v17 }
 0x382   :  { %v1949_v2 = vmul.f32 %v822_v35, %v1710_v7  ;;  %v1951_v63 = vpop.permute.xlu0 %931 }
 0x384   :  { %v966_v46 = vpack.c.bf16 %v1949_v2, %v1946_v18  ;;  %v1955_v5 = vpop.permute.xlu1 %933 }
 0x386   :  { %v700_v19 = vpop.permute.xlu0 %699 }
 0x388   :  { %v702_v24 = vpop.permute.xlu1 %701 }
 0x38a   :  { %v712_v3 = vpop.permute.xlu0 %711 }
 0x38b   :  { %v723_v23 = vsel %vm229_vm4, %v700_v19, %v712_v3 }
 0x38c   :  { %v714_v26 = vpop.permute.xlu1 %713  ;;  %v727_v9 = vmul.f32 %v723_v23, %v1616_v12 }
 0x38d   :  { %v724_v59 = vsel %vm229_vm4, %v702_v24, %v714_v26 }
 0x38e   :  { %v728_v56 = vmul.f32 %v724_v59, %v1616_v12  ;;  %v832_v61 = vpop.permute.xlu0 %831 }
 0x390   :  { %v959_v43 = vpack.c.bf16 %v728_v56, %v727_v9  ;;  %v834_v33 = vpop.permute.xlu1 %833 }
 0x392   :  { %v844_v29 = vpop.permute.xlu0 %843  ;;  %1121 = vmatpush3.bf16.msra.mxu0 %v959_v43 }
 0x393   :  { %v855_v34 = vsel %vm385_vm5, %v832_v61, %v844_v29  ;;  %1122 = vmatprep.subr.bf16.mxu0 %v968_v28 }
 0x394   :  { %v846_v47 = vpop.permute.xlu1 %845  ;;  %v859_v45 = vmul.f32 %v855_v34, %v1637_v36 }
 0x395   :  { %v856_v37 = vsel %vm385_vm5, %v834_v33, %v846_v47 }
 0x396   :  { %v860_v60 = vmul.f32 %v856_v37, %v1637_v36  ;;  %v732_v12 = vpop.permute.xlu0 %731  ;;  %1123 = vmatpush3.bf16.msra.mxu0 %v960_v41 }
 0x398   :  { %v734_v54 = vpop.permute.xlu1 %733  ;;  %v969_v14 = vpack.c.bf16 %v860_v60, %v859_v45 }
 0x39a   :  { %v744_v62 = vpop.permute.xlu0 %743  ;;  %1124 = vmatprep.subr.bf16.mxu0 %v969_v14 }
 0x39b   :  { %v755_v38 = vsel %vm266_vm6, %v732_v12, %v744_v62 }
 0x39c   :  { %v746_v42 = vpop.permute.xlu1 %745  ;;  %v759_v50 = vmul.f32 %v755_v38, %v1649_v21 }
 0x39d   :  { %v756_v49 = vsel %vm266_vm6, %v734_v54, %v746_v42 }
 0x39e   :  { %v760_v16 = vmul.f32 %v756_v49, %v1649_v21  ;;  %v864_v17 = vpop.permute.xlu0 %863 }
 0x3a0   :  { %v961_v36 = vpack.c.bf16 %v760_v16, %v759_v50  ;;  %v866_v35 = vpop.permute.xlu1 %865 }
 0x3a2   :  { %v876_v19 = vpop.permute.xlu0 %875  ;;  %1125 = vmatpush3.bf16.msra.mxu0 %v961_v36 }
 0x3a3   :  { %v887_v32 = vsel %vm422_vm7, %v864_v17, %v876_v19  ;;  %1126 = vmatprep.subr.bf16.mxu0 %v970_v1 }
 0x3a4   :  { %v878_v55 = vpop.permute.xlu1 %877  ;;  %v891_v24 = vmul.f32 %v887_v32, %v1667_v44 }
 0x3a5   :  { %v888_v41 = vsel %vm422_vm7, %v866_v35, %v878_v55 }
 0x3a6   :  { %v892_v3 = vmul.f32 %v888_v41, %v1667_v44  ;;  %v764_v23 = vpop.permute.xlu0 %763  ;;  %1127 = vmatpush3.bf16.msra.mxu0 %v962_v40 }
 0x3a8   :  { %v766_v21 = vpop.permute.xlu1 %765  ;;  %v971_v26 = vpack.c.bf16 %v892_v3, %v891_v24 }
 0x3aa   :  { %v776_v59 = vpop.permute.xlu0 %775  ;;  %1128 = vmatprep.subr.bf16.mxu0 %v971_v26 }
 0x3ab   :  { %v787_v4 = vsel %vm303_vm8, %v764_v23, %v776_v59 }
 0x3ac   :  { %v778_v48 = vpop.permute.xlu1 %777  ;;  %v791_v1 = vmul.f32 %v787_v4, %v1682_v20 }
 0x3ad   :  { %v788_v10 = vsel %vm303_vm8, %v766_v21, %v778_v48 }
 0x3ae   :  { %v792_v9 = vmul.f32 %v788_v10, %v1682_v20  ;;  %v896_v56 = vpop.permute.xlu0 %895 }
 0x3b0   :  { %v963_v44 = vpack.c.bf16 %v792_v9, %v791_v1  ;;  %v898_v61 = vpop.permute.xlu1 %897 }
 0x3b2   :  { %v908_v53 = vpop.permute.xlu0 %907  ;;  %1129 = vmatpush3.bf16.msra.mxu0 %v963_v44 }
 0x3b3   :  { %v919_v6 = vsel %vm459_vm9, %v896_v56, %v908_v53  ;;  %1130 = vmatprep.subr.bf16.mxu0 %v972_v51 }
 0x3b4   :  { %v910_v25 = vpop.permute.xlu1 %909  ;;  %v923_v43 = vmul.f32 %v919_v6, %v1698_v58 }
 0x3b5   :  { %v920_v40 = vsel %vm459_vm9, %v898_v61, %v910_v25 }
 0x3b6   :  { %v924_v33 = vmul.f32 %v920_v40, %v1698_v58  ;;  %v796_v28 = vpop.permute.xlu0 %795  ;;  %1131 = vmatpush3.bf16.msra.mxu0 %v964_v39 }
 0x3b8   :  { %v798_v20 = vpop.permute.xlu1 %797  ;;  %v973_v29 = vpack.c.bf16 %v924_v33, %v923_v43 }
 0x3ba   :  { %v808_v34 = vpop.permute.xlu0 %807  ;;  %1132 = vmatprep.subr.bf16.mxu0 %v973_v29 }
 0x3bb   :  { %v819_v47 = vsel %vm340_vm10, %v796_v28, %v808_v34 }
 0x3bc   :  { %v810_v11 = vpop.permute.xlu1 %809  ;;  %v823_v51 = vmul.f32 %v819_v47, %v1710_v7 }
 0x3bd   :  { %v820_v13 = vsel %vm340_vm10, %v798_v20, %v810_v11 }
 0x3be   :  { %v824_v37 = vmul.f32 %v820_v13, %v1710_v7  ;;  %v928_v45 = vpop.permute.xlu0 %927 }
 0x3c0   :  { %v965_v58 = vpack.c.bf16 %v824_v37, %v823_v51  ;;  %v930_v60 = vpop.permute.xlu1 %929 }
 0x3c2   :  { %v940_v12 = vpop.permute.xlu0 %939  ;;  %1133 = vmatpush3.bf16.msra.mxu0 %v965_v58 }
 0x3c3   :  { %v951_v30 = vsel %vm496_vm2, %v928_v45, %v940_v12  ;;  %1134 = vmatprep.subr.bf16.mxu0 %v974_v52 }
 0x3c4   :  { %v942_v31 = vpop.permute.xlu1 %941  ;;  %v955_v54 = vmul.f32 %v1556_v8, %v951_v30 }
 0x3c5   :  { %v952_v39 = vsel %vm496_vm2, %v930_v60, %v942_v31 }
 0x3c6   :  { %v956_v14 = vmul.f32 %v1556_v8, %v952_v39  ;;  %v944_v62 = vpop.permute.xlu0 %943  ;;  %1135 = vmatpush3.bf16.msra.mxu0 %v966_v46 }
 0x3c7   :  { %v953_v7 = vsel %vm496_vm2, %v1951_v63, %v944_v62 }
 0x3c8   :  { %v975_v38 = vpack.c.bf16 %v956_v14, %v955_v54  ;;  %v946_v42 = vpop.permute.xlu1 %945  ;;  %v957_v0 = vmul.f32 %v1556_v8, %v953_v7 }
 0x3c9   :  { %v954_v27 = vsel %vm496_vm2, %v1955_v5, %v946_v42  ;;  %1010 = vmatmul.mubr.bf16.vlgmr.msra.gmra.mrb[8].mxu0 %v1725_v22 }
 0x3ca   :  { %v958_v52 = vmul.f32 %v1556_v8, %v954_v27  ;;  %1166 = vmatpush3.bf16.msra.mxu1 %v975_v38 }
 0x3cb   :  { %1167 = vmatprep.subr.bf16.mxu1 %v1227_v57 }
 0x3cc   :  { %v976_v49 = vpack.c.bf16 %v958_v52, %v957_v0 }
 0x3ce   :  { %1168 = vmatpush3.bf16.msra.mxu1 %v976_v49 }
 0x3d1   :  { %1170 = vmatmul.mubr.msk.bf16.vlgmr.msra.gmra.mrb[8].mxu1 %vm537_vm3, %v1576_v15 }
 0x49c   :  { %v1136_v18 = vpop.f32.mrb[8].mxu0 }
 0x49d   :  { %v1137_v2 = vpop.f32.mrb[9].mxu0 }
 0x49e   :  { %v1138_v63 = vadd.f32 %v1137_v2, %v1136_v18  ;;  %v1139_v46 = vpop.f32.mrb[10].mxu0 }
 0x49f   :  { %v1140_v50 = vpop.f32.mrb[11].mxu0 }
 0x4a4   :  { %v1051_v22 = vpop.f32.mrb[8].mxu1 }
 0x4a5   :  { %v1052_v5 = vadd.f32 %v1138_v63, %v1051_v22  ;;  %v1171_v16 = vpop.f32.mrb[9].mxu1 }
 0x4a6   :  { %v1054_v8 = vpop.f32.mrb[10].mxu1 }
 0x4a7   :  { %1058 = vst.msk [vmem:[#allocation2 + $0x8] sm:$0xff] %vm621_vm11, %v1052_v5  ;;  %v1172_v57 = vpop.f32.mrb[11].mxu1 }
 0x4a8   :  { %1212 = shalt.err (!%p1209_p4)
}
 0x4a9   :  { %s1213_s18 = scalar_lea.hbm %s2047_s9, 256 }
 0x4aa   :  { %p1214_p5 = scmp.ne.s32.totalorder %s2047_s9, %s1213_s18  ;;  %p1217_p6 = scmp.lt.u32.totalorder %s1213_s18, %s2047_s9 }
 0x4ac   :  { %p1219_p7 = pnand %p1217_p6, %p1214_p5 }
 0x4ae   :  { %1222 = shalt.err (!%p1219_p7)
}
 0x4af   :  { %s1245_s3 = smov 128  }
 0x4b0   :  { %1070 = dma.vmem_to_hbm [thread:$0]  %s1065_s15, 256, %s2047_s9, [#allocation3], %s1245_s3, %s1245_s3, %s1235_s23  }
 0x4b1   :  { %1223 = dma.done.wait [#allocation3], 256  }
 0x4b2   :  { %1224 = vsyncadd [#allocation3], 4294967040 }
 0x4b3   :  { %1074 = vsyncpa [#allocation3], 1 }

</bundles_post_ra>
